<compile_context>
chip_gen: v5e
topology: v5e:2x2
jax: 0.10.0
libtpu: 0.0.40
codegen_flags: <defaults>
</compile_context>

<pallas_src>
import jax
import jax.numpy as jnp
from jax.experimental import pallas as pl
from jax.experimental.pallas import tpu as pltpu


def _round_up(a, b):
    return (a + b - 1) // b * b


def _vmem_capacity_bytes():
    try:
        return int(pltpu.get_tpu_info().vmem_capacity_bytes)
    except Exception:
        return 64 * 1024 * 1024  # conservative default (v7x per-TC VMEM)


# ----------------------------------------------------------------------------
# Pallas kernels
# ----------------------------------------------------------------------------
def _conv_stats_kernel(p_ref, w_ref, raw_ref, ssum_ref, ssq_ref):
    """Per (batch, M-tile): conv-as-matmul + per-channel partial statistics.

    p_ref   : (1, Mt, Kp)   bf16  im2col patches (zero-padded in M and K)
    w_ref   : (Kp, Cp)      bf16  flattened conv weights (zero-padded)
    raw_ref : (1, Mt, Cp)   f32   un-normalized conv output tile
    ssum_ref: (1, 1, 8, Cp) f32   per-tile channel sums (row-broadcast)
    ssq_ref : (1, 1, 8, Cp) f32   per-tile channel sums of squares
    """
    x = p_ref[0]                                            # (Mt, Kp) bf16
    y = jnp.dot(x, w_ref[...], preferred_element_type=jnp.float32)
    raw_ref[0] = y
    s = jnp.sum(y, axis=0, keepdims=True)                   # (1, Cp) f32
    sq = jnp.sum(y * y, axis=0, keepdims=True)              # (1, Cp) f32
    ssum_ref[...] = jnp.broadcast_to(s.reshape(1, 1, 1, -1), ssum_ref.shape)
    ssq_ref[...] = jnp.broadcast_to(sq.reshape(1, 1, 1, -1), ssq_ref.shape)


def _innorm_relu_kernel(raw_ref, mom_ref, o_ref):
    """InstanceNorm3d(affine=False) + ReLU for one M tile.

    raw_ref: (1, Mt, Cp) f32
    mom_ref: (1, 8, Cp)  f32   row 0 = mean, row 1 = inv_std
    o_ref  : (1, Mt, Cp) out dtype
    """
    y = raw_ref[0]                                          # (Mt, Cp)
    mom = mom_ref[0]                                        # (8, Cp)
    mean = mom[0:1, :]
    inv = mom[1:2, :]
    o_ref[0] = jnp.maximum((y - mean) * inv, 0.0).astype(o_ref.dtype)


# ----------------------------------------------------------------------------
# Glue: im2col for a 3x3x3 stride-1 conv with arbitrary padding / dilation
# ----------------------------------------------------------------------------
def _im2col_3d(x, *, padding, dilation):
    # x: (N, D, H, W, C) -> (N, D*H*W, 27*C)
    # TODO(synk): build patches inside the kernel from halo'd channels-last
    # tiles (27 accumulating matmuls) to eliminate this 27x HBM blow-up.
    N, D, H, W, C = x.shape
    p, dil = padding, dilation
    xp = jnp.pad(x, ((0, 0), (p, p), (p, p), (p, p), (0, 0)))
    cols = []
    for kd in range(3):
        for kh in range(3):
            for kw in range(3):
                cols.append(
                    xp[:, kd * dil:kd * dil + D,
                       kh * dil:kh * dil + H,
                       kw * dil:kw * dil + W, :])
    patches = jnp.concatenate(cols, axis=-1)                # (N, D, H, W, 27*C)
    return patches.reshape(N, D * H * W, 27 * C)


def _pick_m_tile(M, Kp, Cp, vmem_cap):
    """Largest M tile (multiple of 16) keeping double-buffered blocks in budget."""
    budget = max(16 << 20, min(vmem_cap // 3, 48 << 20))
    w_bytes = 2 * (Kp * Cp * 2)                 # bf16 weights, double-buffered
    per_row = 2 * (2 * Kp + 8 * Cp)             # bf16 patch + f32 raw/out, x2 buffers
    mt = max(16, (budget - w_bytes) // per_row)
    mt = int(min(mt, 2048))
    if mt >= M:
        return _round_up(M, 16)
    return max(16, (mt // 16) * 16)


# ----------------------------------------------------------------------------
# Fused Conv3d(3x3x3) -> InstanceNorm3d(affine=False) -> ReLU (two Pallas passes)
# ----------------------------------------------------------------------------
def conv3d_innorm_relu(x, w, *, padding, dilation, out_dtype=jnp.float32, eps=1e-5):
    """x: (N, D, H, W, Cin) channels-last. w: (3, 3, 3, Cin, Cout).

    No conv bias: InstanceNorm(affine=False) immediately after the conv cancels
    any per-channel bias exactly, so it is omitted (same forward semantics).
    """
    N, D, H, W, Cin = x.shape
    Cout = w.shape[-1]
    M = D * H * W
    K = 27 * Cin
    Kp = _round_up(K, 128)                      # lane-dense contraction dim
    Cp = _round_up(max(Cout, 128), 128)         # lane-dense output channels

    vmem_cap = _vmem_capacity_bytes()
    Mt = _pick_m_tile(M, Kp, Cp, vmem_cap)
    Mp = _round_up(M, Mt)
    nM = Mp // Mt
    vmem_limit = int(min(max(vmem_cap - (8 << 20), 32 << 20), 100 << 20))

    # bf16 patches (half the HBM traffic of f32); zero-pad M and K so every
    # block is full — zero rows contribute exactly 0 to the channel statistics.
    patches = _im2col_3d(x.astype(jnp.bfloat16), padding=padding, dilation=dilation)
    patches = jnp.pad(patches, ((0, 0), (0, Mp - M), (0, Kp - K)))
    wf = jnp.pad(w.reshape(K, Cout).astype(jnp.bfloat16),
                 ((0, Kp - K), (0, Cp - Cout)))

    cparams = pltpu.CompilerParams(
        dimension_semantics=("parallel", "parallel"),
        vmem_limit_bytes=vmem_limit)

    # Pass 1: matmul conv + per-tile partial channel sums / sums of squares.
    raw, ssum, ssq = pl.pallas_call(
        _conv_stats_kernel,
        out_shape=(
            jax.ShapeDtypeStruct((N, Mp, Cp), jnp.float32),
            jax.ShapeDtypeStruct((N, nM, 8, Cp), jnp.float32),
            jax.ShapeDtypeStruct((N, nM, 8, Cp), jnp.float32),
        ),
        grid=(N, nM),
        in_specs=[
            pl.BlockSpec((1, Mt, Kp), lambda n, m: (n, m, 0)),
            pl.BlockSpec((Kp, Cp), lambda n, m: (0, 0)),
        ],
        out_specs=(
            pl.BlockSpec((1, Mt, Cp), lambda n, m: (n, m, 0)),
            pl.BlockSpec((1, 1, 8, Cp), lambda n, m: (n, m, 0, 0)),
            pl.BlockSpec((1, 1, 8, Cp), lambda n, m: (n, m, 0, 0)),
        ),
        compiler_params=cparams,
    )(patches, wf)

    # Combine partial statistics (tiny XLA reduction); divide by the true count
    # M (padded rows contribute 0).  f32 accumulators; clamp var >= 0 to guard
    # the E[x^2]-E[x]^2 cancellation.
    sum_tot = ssum[:, :, 0, :].sum(axis=1)               # (N, Cp)
    sq_tot = ssq[:, :, 0, :].sum(axis=1)                 # (N, Cp)
    mean = sum_tot / float(M)
    var = jnp.maximum(sq_tot / float(M) - mean * mean, 0.0)
    inv = jax.lax.rsqrt(var + eps)
    mom = jnp.concatenate(
        [mean[:, None, :], inv[:, None, :], jnp.zeros((N, 6, Cp), jnp.float32)],
        axis=1)                                          # (N, 8, Cp)

    # Pass 2: normalize + ReLU, lane-dense (Cp=128k) stores.
    out = pl.pallas_call(
        _innorm_relu_kernel,
        out_shape=jax.ShapeDtypeStruct((N, Mp, Cp), out_dtype),
        grid=(N, nM),
        in_specs=[
            pl.BlockSpec((1, Mt, Cp), lambda n, m: (n, m, 0)),
            pl.BlockSpec((1, 8, Cp), lambda n, m: (n, 0, 0)),
        ],
        out_specs=pl.BlockSpec((1, Mt, Cp), lambda n, m: (n, m, 0)),
        compiler_params=cparams,
    )(raw, mom)

    return out[:, :M, :Cout].reshape(N, D, H, W, Cout)


# ----------------------------------------------------------------------------
# Parameter init (deterministic, PyTorch-Conv3d-style uniform bounds)
# ----------------------------------------------------------------------------
def init_up_params(key, in_ch, out_ch):
    # Conv biases are omitted on purpose: InstanceNorm3d(affine=False) right
    # after each conv cancels them exactly (they are dead parameters).
    def conv_init(k, cin, cout):
        fan_in = cin * 27
        bound = 1.0 / jnp.sqrt(jnp.float32(fan_in))
        return jax.random.uniform(k, (3, 3, 3, cin, cout), jnp.float32, -bound, bound)

    k1, k2 = jax.random.split(key)
    return dict(w1=conv_init(k1, in_ch, out_ch),    # conv_13 (dilated)
                w2=conv_init(k2, out_ch, out_ch))   # conv_2


# ----------------------------------------------------------------------------
# `up.forward(x1, x2)` — inputs in PyTorch NCDHW layout
# ----------------------------------------------------------------------------
def up_forward(params, x1, x2):
    N, C1, D1, H1, W1 = x1.shape

    # nn.Upsample(scale_factor=2, mode='trilinear', align_corners=False):
    # jax.image.resize 'trilinear' uses half-pixel centers == align_corners=False.
    # TODO(synk): fuse upsample + pad + concat into the first conv's patch
    # construction to avoid these extra whole-volume HBM round trips.
    x1u = jax.image.resize(x1, (N, C1, 2 * D1, 2 * H1, 2 * W1), method="trilinear")

    # Module's (asymmetric-sign) diff / F.pad logic; lax.pad supports negative
    # widths (cropping), matching F.pad behaviour for negative pads.
    diffX = x1u.shape[2] - x2.shape[2]
    diffY = x2.shape[3] - x1u.shape[3]
    diffZ = x2.shape[4] - x1u.shape[4]
    pad_cfg = ((0, 0, 0), (0, 0, 0),
               (diffX // 2, diffX - diffX // 2, 0),
               (diffY // 2, diffY - diffY // 2, 0),
               (diffZ // 2, diffZ - diffZ // 2, 0))
    x1p = jax.lax.pad(x1u, jnp.array(0.0, x1u.dtype), pad_cfg)

    x = jnp.concatenate([x2, x1p], axis=1)               # NCDHW, channels = in_ch
    x = jnp.transpose(x, (0, 2, 3, 4, 1))                # -> NDHWC (channels-last)

    # double_conv2: [conv(k3,p2,d2)->IN->ReLU] -> [conv(k3,p1)->IN->ReLU]
    x = conv3d_innorm_relu(x, params["w1"], padding=2, dilation=2,
                           out_dtype=jnp.bfloat16)       # bf16 intermediate
    x = conv3d_innorm_relu(x, params["w2"], padding=1, dilation=1,
                           out_dtype=jnp.float32)

    return jnp.transpose(x, (0, 4, 1, 2, 3))             # -> NCDHW


# ----------------------------------------------------------------------------
if __name__ == "__main__":
    key = jax.random.PRNGKey(0)
    in_ch, out_ch = 6, 8
    c1 = in_ch * 2 // 3          # channels of x1 (decoder feature, pre-upsample)
    c2 = in_ch - c1              # channels of x2 (skip connection)

    kx1, kx2, kp = jax.random.split(key, 3)
    x1 = jax.random.normal(kx1, (2, c1, 4, 4, 4), jnp.float32)   # NCDHW
    x2 = jax.random.normal(kx2, (2, c2, 8, 8, 8), jnp.float32)   # NCDHW
    params = init_up_params(kp, in_ch, out_ch)

    out = jax.jit(up_forward)(params, x1, x2)
    jax.block_until_ready(out)
    assert out.shape == (2, out_ch, 8, 8, 8), out.shape
    assert bool(jnp.all(jnp.isfinite(out)))
    print("KERNEL_OK")
</pallas_src>

<mosaic_0001>
module attributes {stable_mosaic.version = 11 : i64} {
  func.func @_conv_stats_kernel(%arg0: i32, %arg1: i32, %arg2: memref<1x512x256xbf16, #tpu.memory_space<vmem>>, %arg3: memref<256x128xbf16, #tpu.memory_space<vmem>>, %arg4: memref<1x512x128xf32, #tpu.memory_space<vmem>>, %arg5: memref<1x1x8x128xf32, #tpu.memory_space<vmem>>, %arg6: memref<1x1x8x128xf32, #tpu.memory_space<vmem>>) attributes {dimension_semantics = [#tpu.dimension_semantics<parallel>, #tpu.dimension_semantics<parallel>], iteration_bounds = array<i64: 2, 1>, scalar_prefetch = 0 : i64, scratch_operands = 0 : i64, tpu.core_type = #tpu.core_type<tc>, window_params = [{transform_indices = @transform_0, window_bounds = array<i64: 1, 512, 256>}, {pipeline_mode = #tpu.pipeline_mode<synchronous>, transform_indices = @transform_1, window_bounds = array<i64: 256, 128>}, {transform_indices = @transform_2, window_bounds = array<i64: 1, 512, 128>}, {transform_indices = @transform_3, window_bounds = array<i64: 1, 1, 8, 128>}, {transform_indices = @transform_4, window_bounds = array<i64: 1, 1, 8, 128>}]} {
    %c0 = arith.constant 0 : index
    %c0_0 = arith.constant 0 : index
    %c0_1 = arith.constant 0 : index
    %0 = vector.load %arg2[%c0, %c0_0, %c0_1] : memref<1x512x256xbf16, #tpu.memory_space<vmem>>, vector<1x512x256xbf16>
    %1 = vector.shape_cast %0 : vector<1x512x256xbf16> to vector<512x256xbf16>
    %c0_2 = arith.constant 0 : index
    %c0_3 = arith.constant 0 : index
    %2 = vector.load %arg3[%c0_2, %c0_3] : memref<256x128xbf16, #tpu.memory_space<vmem>>, vector<256x128xbf16>
    %cst = arith.constant dense<0.000000e+00> : vector<512x128xf32>
    %3 = tpu.matmul %1, %2, %cst {dimension_numbers = #tpu.dot_dimension_numbers<[1], [0], [0], [1], [0, 0, 1, 1], [], []>} : vector<512x256xbf16>, vector<256x128xbf16>, vector<512x128xf32> -> vector<512x128xf32>
    %c0_4 = arith.constant 0 : index
    %c0_5 = arith.constant 0 : index
    %c0_6 = arith.constant 0 : index
    %4 = vector.load %arg4[%c0_4, %c0_5, %c0_6] : memref<1x512x128xf32, #tpu.memory_space<vmem>>, vector<1x512x128xf32>
    %5 = vector.shape_cast %4 : vector<1x512x128xf32> to vector<512x128xf32>
    %6 = vector.shape_cast %3 : vector<512x128xf32> to vector<1x512x128xf32>
    tpu.vector_store %arg4[%c0_4, %c0_5, %c0_6], %6 {strides = array<i32>} : memref<1x512x128xf32, #tpu.memory_space<vmem>>, vector<1x512x128xf32>,
    %cst_7 = arith.constant dense<0.000000e+00> : vector<128xf32>
    %7 = vector.multi_reduction <add>, %3, %cst_7 [0] : vector<512x128xf32> to vector<128xf32>
    %8 = vector.shape_cast %7 : vector<128xf32> to vector<1x128xf32>
    %9 = arith.mulf %3, %3 : vector<512x128xf32>
    %cst_8 = arith.constant dense<0.000000e+00> : vector<128xf32>
    %10 = vector.multi_reduction <add>, %9, %cst_8 [0] : vector<512x128xf32> to vector<128xf32>
    %11 = vector.shape_cast %10 : vector<128xf32> to vector<1x128xf32>
    %12 = vector.shape_cast %8 : vector<1x128xf32> to vector<1x1x1x128xf32>
    %13 = vector.shape_cast %12 : vector<1x1x1x128xf32> to vector<1x1x1x128xf32>
    %14 = vector.broadcast %13 : vector<1x1x1x128xf32> to vector<1x1x8x128xf32>
    %c0_9 = arith.constant 0 : index
    %c0_10 = arith.constant 0 : index
    %c0_11 = arith.constant 0 : index
    %c0_12 = arith.constant 0 : index
    %15 = vector.load %arg5[%c0_9, %c0_10, %c0_11, %c0_12] : memref<1x1x8x128xf32, #tpu.memory_space<vmem>>, vector<1x1x8x128xf32>
    tpu.vector_store %arg5[%c0_9, %c0_10, %c0_11, %c0_12], %14 {strides = array<i32>} : memref<1x1x8x128xf32, #tpu.memory_space<vmem>>, vector<1x1x8x128xf32>,
    %16 = vector.shape_cast %11 : vector<1x128xf32> to vector<1x1x1x128xf32>
    %17 = vector.shape_cast %16 : vector<1x1x1x128xf32> to vector<1x1x1x128xf32>
    %18 = vector.broadcast %17 : vector<1x1x1x128xf32> to vector<1x1x8x128xf32>
    %c0_13 = arith.constant 0 : index
    %c0_14 = arith.constant 0 : index
    %c0_15 = arith.constant 0 : index
    %c0_16 = arith.constant 0 : index
    %19 = vector.load %arg6[%c0_13, %c0_14, %c0_15, %c0_16] : memref<1x1x8x128xf32, #tpu.memory_space<vmem>>, vector<1x1x8x128xf32>
    tpu.vector_store %arg6[%c0_13, %c0_14, %c0_15, %c0_16], %18 {strides = array<i32>} : memref<1x1x8x128xf32, #tpu.memory_space<vmem>>, vector<1x1x8x128xf32>,
    return
  }
  func.func @transform_0(%arg0: i32, %arg1: i32) -> (i32, i32, i32) {
    %c0_i32 = arith.constant 0 : i32
    %c0_i32_0 = arith.constant 0 : i32
    return %arg0, %arg1, %c0_i32 : i32, i32, i32
  }
  func.func @transform_1(%arg0: i32, %arg1: i32) -> (i32, i32) {
    %c0_i32 = arith.constant 0 : i32
    %c0_i32_0 = arith.constant 0 : i32
    %c0_i32_1 = arith.constant 0 : i32
    return %c0_i32, %c0_i32_0 : i32, i32
  }
  func.func @transform_2(%arg0: i32, %arg1: i32) -> (i32, i32, i32) {
    %c0_i32 = arith.constant 0 : i32
    %c0_i32_0 = arith.constant 0 : i32
    return %arg0, %arg1, %c0_i32 : i32, i32, i32
  }
  func.func @transform_3(%arg0: i32, %arg1: i32) -> (i32, i32, i32, i32) {
    %c0_i32 = arith.constant 0 : i32
    %c0_i32_0 = arith.constant 0 : i32
    %c0_i32_1 = arith.constant 0 : i32
    return %arg0, %arg1, %c0_i32, %c0_i32_0 : i32, i32, i32, i32
  }
  func.func @transform_4(%arg0: i32, %arg1: i32) -> (i32, i32, i32, i32) {
    %c0_i32 = arith.constant 0 : i32
    %c0_i32_0 = arith.constant 0 : i32
    %c0_i32_1 = arith.constant 0 : i32
    return %arg0, %arg1, %c0_i32, %c0_i32_0 : i32, i32, i32, i32
  }
}

module attributes {stable_mosaic.version = 11 : i64} {
  func.func @_innorm_relu_kernel(%arg0: i32, %arg1: i32, %arg2: memref<1x512x128xf32, #tpu.memory_space<vmem>>, %arg3: memref<1x8x128xf32, #tpu.memory_space<vmem>>, %arg4: memref<1x512x128xbf16, #tpu.memory_space<vmem>>) attributes {dimension_semantics = [#tpu.dimension_semantics<parallel>, #tpu.dimension_semantics<parallel>], iteration_bounds = array<i64: 2, 1>, scalar_prefetch = 0 : i64, scratch_operands = 0 : i64, tpu.core_type = #tpu.core_type<tc>, window_params = [{transform_indices = @transform_0, window_bounds = array<i64: 1, 512, 128>}, {transform_indices = @transform_1, window_bounds = array<i64: 1, 8, 128>}, {transform_indices = @transform_2, window_bounds = array<i64: 1, 512, 128>}]} {
    %c0 = arith.constant 0 : index
    %c0_0 = arith.constant 0 : index
    %c0_1 = arith.constant 0 : index
    %0 = vector.load %arg2[%c0, %c0_0, %c0_1] : memref<1x512x128xf32, #tpu.memory_space<vmem>>, vector<1x512x128xf32>
    %1 = vector.shape_cast %0 : vector<1x512x128xf32> to vector<512x128xf32>
    %c0_2 = arith.constant 0 : index
    %c0_3 = arith.constant 0 : index
    %c0_4 = arith.constant 0 : index
    %2 = vector.load %arg3[%c0_2, %c0_3, %c0_4] : memref<1x8x128xf32, #tpu.memory_space<vmem>>, vector<1x8x128xf32>
    %3 = vector.shape_cast %2 : vector<1x8x128xf32> to vector<8x128xf32>
    %4 = vector.extract_strided_slice %3 {offsets = [0, 0], sizes = [1, 128], strides = [1, 1]} : vector<8x128xf32> to vector<1x128xf32>
    %5 = vector.extract_strided_slice %3 {offsets = [1, 0], sizes = [1, 128], strides = [1, 1]} : vector<8x128xf32> to vector<1x128xf32>
    %6 = vector.broadcast %4 : vector<1x128xf32> to vector<512x128xf32>
    %7 = arith.subf %1, %6 : vector<512x128xf32>
    %8 = vector.broadcast %5 : vector<1x128xf32> to vector<512x128xf32>
    %9 = arith.mulf %7, %8 : vector<512x128xf32>
    %cst = arith.constant 0.000000e+00 : f32
    %10 = vector.broadcast %cst : f32 to vector<512x128xf32>
    %11 = arith.maximumf %9, %10 : vector<512x128xf32>
    %12 = arith.truncf %11 : vector<512x128xf32> to vector<512x128xbf16>
    %c0_5 = arith.constant 0 : index
    %c0_6 = arith.constant 0 : index
    %c0_7 = arith.constant 0 : index
    %13 = vector.load %arg4[%c0_5, %c0_6, %c0_7] : memref<1x512x128xbf16, #tpu.memory_space<vmem>>, vector<1x512x128xbf16>
    %14 = vector.shape_cast %13 : vector<1x512x128xbf16> to vector<512x128xbf16>
    %15 = vector.shape_cast %12 : vector<512x128xbf16> to vector<1x512x128xbf16>
    tpu.vector_store %arg4[%c0_5, %c0_6, %c0_7], %15 {strides = array<i32>} : memref<1x512x128xbf16, #tpu.memory_space<vmem>>, vector<1x512x128xbf16>,
    return
  }
  func.func @transform_0(%arg0: i32, %arg1: i32) -> (i32, i32, i32) {
    %c0_i32 = arith.constant 0 : i32
    %c0_i32_0 = arith.constant 0 : i32
    return %arg0, %arg1, %c0_i32 : i32, i32, i32
  }
  func.func @transform_1(%arg0: i32, %arg1: i32) -> (i32, i32, i32) {
    %c0_i32 = arith.constant 0 : i32
    %c0_i32_0 = arith.constant 0 : i32
    %c0_i32_1 = arith.constant 0 : i32
    return %arg0, %c0_i32, %c0_i32_0 : i32, i32, i32
  }
  func.func @transform_2(%arg0: i32, %arg1: i32) -> (i32, i32, i32) {
    %c0_i32 = arith.constant 0 : i32
    %c0_i32_0 = arith.constant 0 : i32
    return %arg0, %arg1, %c0_i32 : i32, i32, i32
  }
}

module attributes {stable_mosaic.version = 11 : i64} {
  func.func @_innorm_relu_kernel(%arg0: i32, %arg1: i32, %arg2: memref<1x512x128xf32, #tpu.memory_space<vmem>>, %arg3: memref<1x8x128xf32, #tpu.memory_space<vmem>>, %arg4: memref<1x512x128xf32, #tpu.memory_space<vmem>>) attributes {dimension_semantics = [#tpu.dimension_semantics<parallel>, #tpu.dimension_semantics<parallel>], iteration_bounds = array<i64: 2, 1>, scalar_prefetch = 0 : i64, scratch_operands = 0 : i64, tpu.core_type = #tpu.core_type<tc>, window_params = [{transform_indices = @transform_0, window_bounds = array<i64: 1, 512, 128>}, {transform_indices = @transform_1, window_bounds = array<i64: 1, 8, 128>}, {transform_indices = @transform_2, window_bounds = array<i64: 1, 512, 128>}]} {
    %c0 = arith.constant 0 : index
    %c0_0 = arith.constant 0 : index
    %c0_1 = arith.constant 0 : index
    %0 = vector.load %arg2[%c0, %c0_0, %c0_1] : memref<1x512x128xf32, #tpu.memory_space<vmem>>, vector<1x512x128xf32>
    %1 = vector.shape_cast %0 : vector<1x512x128xf32> to vector<512x128xf32>
    %c0_2 = arith.constant 0 : index
    %c0_3 = arith.constant 0 : index
    %c0_4 = arith.constant 0 : index
    %2 = vector.load %arg3[%c0_2, %c0_3, %c0_4] : memref<1x8x128xf32, #tpu.memory_space<vmem>>, vector<1x8x128xf32>
    %3 = vector.shape_cast %2 : vector<1x8x128xf32> to vector<8x128xf32>
    %4 = vector.extract_strided_slice %3 {offsets = [0, 0], sizes = [1, 128], strides = [1, 1]} : vector<8x128xf32> to vector<1x128xf32>
    %5 = vector.extract_strided_slice %3 {offsets = [1, 0], sizes = [1, 128], strides = [1, 1]} : vector<8x128xf32> to vector<1x128xf32>
    %6 = vector.broadcast %4 : vector<1x128xf32> to vector<512x128xf32>
    %7 = arith.subf %1, %6 : vector<512x128xf32>
    %8 = vector.broadcast %5 : vector<1x128xf32> to vector<512x128xf32>
    %9 = arith.mulf %7, %8 : vector<512x128xf32>
    %cst = arith.constant 0.000000e+00 : f32
    %10 = vector.broadcast %cst : f32 to vector<512x128xf32>
    %11 = arith.maximumf %9, %10 : vector<512x128xf32>
    %c0_5 = arith.constant 0 : index
    %c0_6 = arith.constant 0 : index
    %c0_7 = arith.constant 0 : index
    %12 = vector.load %arg4[%c0_5, %c0_6, %c0_7] : memref<1x512x128xf32, #tpu.memory_space<vmem>>, vector<1x512x128xf32>
    %13 = vector.shape_cast %12 : vector<1x512x128xf32> to vector<512x128xf32>
    %14 = vector.shape_cast %11 : vector<512x128xf32> to vector<1x512x128xf32>
    tpu.vector_store %arg4[%c0_5, %c0_6, %c0_7], %14 {strides = array<i32>} : memref<1x512x128xf32, #tpu.memory_space<vmem>>, vector<1x512x128xf32>,
    return
  }
  func.func @transform_0(%arg0: i32, %arg1: i32) -> (i32, i32, i32) {
    %c0_i32 = arith.constant 0 : i32
    %c0_i32_0 = arith.constant 0 : i32
    return %arg0, %arg1, %c0_i32 : i32, i32, i32
  }
  func.func @transform_1(%arg0: i32, %arg1: i32) -> (i32, i32, i32) {
    %c0_i32 = arith.constant 0 : i32
    %c0_i32_0 = arith.constant 0 : i32
    %c0_i32_1 = arith.constant 0 : i32
    return %arg0, %c0_i32, %c0_i32_0 : i32, i32, i32
  }
  func.func @transform_2(%arg0: i32, %arg1: i32) -> (i32, i32, i32) {
    %c0_i32 = arith.constant 0 : i32
    %c0_i32_0 = arith.constant 0 : i32
    return %arg0, %arg1, %c0_i32 : i32, i32, i32
  }
}

</mosaic_0001>

<bundles_post_ra>
// kernel: up_forward.4
= control target key start
LH: loop header
LB: loop body
LE: loop exit
PB: predicated region body
PF: predicated region fallthrough
CT: control target
= control target key end

     0   :  { %s2071_s15 = smov 0   ;;  %s2073_s16 = smov 0   ;;  %s2570_s0 = inlined_call_operand.vmem [shape: bf16[2,512,256], index: 0, kind: input, shape index: {}]   ;;  %s2571_s1 = inlined_call_operand.vmem [shape: bf16[256,128], index: 1, kind: input, shape index: {}]   ;;  %s2572_s2 = inlined_call_operand.vmem [shape: f32[2,512,128], index: 2, kind: output, shape index: {0}]   ;;  %s2573_s3 = inlined_call_operand.vmem [shape: f32[2,1,8,128], index: 3, kind: output, shape index: {1}]   ;;  %s2574_s4 = inlined_call_operand.vmem [shape: f32[2,1,8,128], index: 4, kind: output, shape index: {2}]  }
   0x1   :  { %s2075_s17 = smov 0  }
   0x2 LB: > { %s27_s18 = sadd.s32 1, %s2040_s16  ;;  %p1571_p0 = scmp.ge.s32.totalorder %s2044_s17, 1  ;;  %s2044_s17 = sphi %s2075_s17, %s15_s17   ;;  %s2040_s16 = sphi %s2073_s16, %s2576_s16   ;;  %s2036_s15 = sphi %s2071_s15, %s2575_s15  }
   0x3   : > { %p29_p1 = scmp.ge.s32.totalorder %s27_s18, 2  ;;  %p193_p2 = scmp.lt.s32.totalorder %s2044_s17, 3 }
   0x5   : > { %s2578_s18 = smov (%p29_p1, %s27_s18), 0  ;;  %p194_p3 = pnand %p1571_p0, %p193_p2 }
   0x6   : > { %p243_p4 = scmp.lt.s32.totalorder (!%p194_p3), %s2036_s15, 1 }
   0x7   : > { %197 = sbr.rel (%p194_p3) target bundleno = 502 (0x1f6), region = 28 }
   0xc   : > { %v1973_v0 = vld [vmem:[%s2571_s1 + $0x38] sm:$0xff]  ;;  %v1972_v2 = vld [vmem:[%s2571_s1 + $0x30] sm:$0xff]  ;;  %v1971_v4 = vld [vmem:[%s2571_s1 + $0x28] sm:$0xff]  ;;  %s2580_s15 = smov (!%p243_p4, %s2036_s15), 1 }
   0xd   : > { %v1981_v1 = vld [vmem:[%s2571_s1 + $0x78] sm:$0xff]  ;;  %789 = vmatpush.bf16.msra.mxu0 %v1973_v0  ;;  %v1980_v3 = vld [vmem:[%s2571_s1 + $0x70] sm:$0xff]  ;;  %1982 = vmatpush.bf16.msra.mxu2 %v1973_v0  ;;  %v1979_v5 = vld [vmem:[%s2571_s1 + $0x68] sm:$0xff]  ;;  %s1900_s21 = sshll.u32 %s2580_s15, 9  ;;  %s1576_s10 = sshll.u32 %s2580_s15, 3 }
   0xe   : > { %958 = vmatpush.bf16.msra.mxu1 %v1981_v1  ;;  %1990 = vmatpush.bf16.msra.mxu3 %v1981_v1  ;;  %v1970_v6 = vld [vmem:[%s2571_s1 + $0x20] sm:$0xff]  ;;  %v1969_v8 = vld [vmem:[%s2571_s1 + $0x18] sm:$0xff]  ;;  %v1968_v10 = vld [vmem:[%s2571_s1 + $0x10] sm:$0xff]  ;;  %s2143_s28 = scalar_lea.vmem %s2570_s0, %s1900_s21  ;;  %s2220_s9 = scalar_lea.vmem %s2572_s2, %s1900_s21 }
   0xf   : > { %v1978_v7 = vld [vmem:[%s2571_s1 + $0x60] sm:$0xff]  ;;  %v1977_v9 = vld [vmem:[%s2571_s1 + $0x58] sm:$0xff]  ;;  %v1976_v11 = vld [vmem:[%s2571_s1 + $0x50] sm:$0xff]  ;;  %s269_s13 = scalar_lea.vmem %s2573_s3, %s1576_s10  ;;  %s276_s20 = scalar_lea.vmem %s2574_s4, %s1576_s10 }
  0x10   : > { %v1967_v12 = vld [vmem:[%s2571_s1 + $0x8] sm:$0xff]  ;;  %v1966_v14 = vld [vmem:[%s2571_s1] sm:$0xff]  ;;  %v1588_v22 = vld [vmem:[%s2143_s28 + $0x10] sm:$0xf] }
  0x11   : > { %790 = vmatpush.bf16.msra.mxu0 %v1972_v2  ;;  %1983 = vmatpush.bf16.msra.mxu2 %v1972_v2  ;;  %v1975_v13 = vld [vmem:[%s2571_s1 + $0x48] sm:$0xff]  ;;  %v1974_v15 = vld [vmem:[%s2571_s1 + $0x40] sm:$0xff]  ;;  %v1905_v23 = vld [vmem:[%s2143_s28 + $0x14] sm:$0xf0] }
  0x12   : > { %959 = vmatpush.bf16.msra.mxu1 %v1980_v3  ;;  %1991 = vmatpush.bf16.msra.mxu3 %v1980_v3  ;;  %v1580_v16 = vld [vmem:[%s2143_s28] sm:$0xf]  ;;  %v1903_v17 = vld [vmem:[%s2143_s28 + $0x4] sm:$0xf0]  ;;  %v1902_v18 = vld [vmem:[%s2143_s28 + $0x4] sm:$0xf]  ;;  %v1589_v26 = vor.u32 %v1905_v23, %v1588_v22 }
  0x13   : > { %v1582_v19 = vld [vmem:[%s2143_s28 + $0x8] sm:$0xf0]  ;;  %v1581_v20 = vor.u32 %v1903_v17, %v1580_v16  ;;  %v1904_v24 = vld [vmem:[%s2143_s28 + $0x14] sm:$0xf]  ;;  %v1590_v25 = vld [vmem:[%s2143_s28 + $0x18] sm:$0xf0] }
  0x14   : > { %v1585_v21 = vor.u32 %v1902_v18, %v1582_v19  ;;  %v1593_v27 = vor.u32 %v1904_v24, %v1590_v25  ;;  %v1708_v28 = vld [vmem:[%s2143_s28 + $0x100] sm:$0xf]  ;;  %v1935_v29 = vld [vmem:[%s2143_s28 + $0x104] sm:$0xf0]  ;;  %v1934_v30 = vld [vmem:[%s2143_s28 + $0x104] sm:$0xf] }
  0x15   : > { %791 = vmatpush.bf16.msra.mxu0 %v1971_v4  ;;  %1984 = vmatpush.bf16.msra.mxu2 %v1971_v4  ;;  %v1709_v31 = vor.u32 %v1935_v29, %v1708_v28  ;;  %v1710_v32 = vld [vmem:[%s2143_s28 + $0x108] sm:$0xf0]  ;;  %v1596_v34 = vld [vmem:[%s2143_s28 + $0x20] sm:$0xf]  ;;  %v1907_v35 = vld [vmem:[%s2143_s28 + $0x24] sm:$0xf0] }
  0x16   : > { %960 = vmatpush.bf16.msra.mxu1 %v1979_v5  ;;  %1992 = vmatpush.bf16.msra.mxu3 %v1979_v5  ;;  %v1713_v33 = vor.u32 %v1934_v30, %v1710_v32  ;;  %v1906_v36 = vld [vmem:[%s2143_s28 + $0x24] sm:$0xf]  ;;  %v1598_v37 = vld [vmem:[%s2143_s28 + $0x28] sm:$0xf0]  ;;  %v1597_v38 = vor.u32 %v1907_v35, %v1596_v34  ;;  %v1716_v40 = vld [vmem:[%s2143_s28 + $0x110] sm:$0xf] }
  0x17   : > { %v1601_v39 = vor.u32 %v1906_v36, %v1598_v37  ;;  %v1937_v41 = vld [vmem:[%s2143_s28 + $0x114] sm:$0xf0]  ;;  %v1936_v42 = vld [vmem:[%s2143_s28 + $0x114] sm:$0xf]  ;;  %v1718_v44 = vld [vmem:[%s2143_s28 + $0x118] sm:$0xf0] }
  0x18   : > { %v1717_v43 = vor.u32 %v1937_v41, %v1716_v40  ;;  %v1721_v45 = vor.u32 %v1936_v42, %v1718_v44  ;;  %v1604_v46 = vld [vmem:[%s2143_s28 + $0x30] sm:$0xf]  ;;  %v1909_v47 = vld [vmem:[%s2143_s28 + $0x34] sm:$0xf0]  ;;  %v1908_v48 = vld [vmem:[%s2143_s28 + $0x34] sm:$0xf] }
  0x19   : > { %792 = vmatpush.bf16.msra.mxu0 %v1970_v6  ;;  %1985 = vmatpush.bf16.msra.mxu2 %v1970_v6  ;;  %v1606_v49 = vld [vmem:[%s2143_s28 + $0x38] sm:$0xf0]  ;;  %v1605_v50 = vor.u32 %v1909_v47, %v1604_v46  ;;  %v1724_v52 = vld [vmem:[%s2143_s28 + $0x120] sm:$0xf]  ;;  %v1939_v53 = vld [vmem:[%s2143_s28 + $0x124] sm:$0xf0] }
  0x1a   : > { %961 = vmatpush.bf16.msra.mxu1 %v1978_v7  ;;  %1993 = vmatpush.bf16.msra.mxu3 %v1978_v7  ;;  %v1609_v51 = vor.u32 %v1908_v48, %v1606_v49  ;;  %v1938_v54 = vld [vmem:[%s2143_s28 + $0x124] sm:$0xf]  ;;  %v1725_v55 = vor.u32 %v1939_v53, %v1724_v52  ;;  %v1726_v56 = vld [vmem:[%s2143_s28 + $0x128] sm:$0xf0]  ;;  %v1612_v58 = vld [vmem:[%s2143_s28 + $0x40] sm:$0xf] }
  0x1b   : > { %v1729_v57 = vor.u32 %v1938_v54, %v1726_v56  ;;  %v1911_v59 = vld [vmem:[%s2143_s28 + $0x44] sm:$0xf0]  ;;  %v1910_v60 = vld [vmem:[%s2143_s28 + $0x44] sm:$0xf]  ;;  %v1614_v61 = vld [vmem:[%s2143_s28 + $0x48] sm:$0xf0] }
  0x1c   : > { %v1613_v62 = vor.u32 %v1911_v59, %v1612_v58  ;;  %v1617_v63 = vor.u32 %v1910_v60, %v1614_v61  ;;  %v1732_v0 = vld [vmem:[%s2143_s28 + $0x130] sm:$0xf]  ;;  %v1941_v1 = vld [vmem:[%s2143_s28 + $0x134] sm:$0xf0]  ;;  %v1940_v2 = vld [vmem:[%s2143_s28 + $0x134] sm:$0xf] }
  0x1d   : > { %793 = vmatpush.bf16.msra.mxu0 %v1969_v8  ;;  %1986 = vmatpush.bf16.msra.mxu2 %v1969_v8  ;;  %v1733_v3 = vor.u32 %v1941_v1, %v1732_v0  ;;  %v1734_v4 = vld [vmem:[%s2143_s28 + $0x138] sm:$0xf0]  ;;  %v1620_v6 = vld [vmem:[%s2143_s28 + $0x50] sm:$0xf]  ;;  %v1913_v7 = vld [vmem:[%s2143_s28 + $0x54] sm:$0xf0] }
  0x1e   : > { %962 = vmatpush.bf16.msra.mxu1 %v1977_v9  ;;  %1994 = vmatpush.bf16.msra.mxu3 %v1977_v9  ;;  %v1737_v5 = vor.u32 %v1940_v2, %v1734_v4  ;;  %v1912_v8 = vld [vmem:[%s2143_s28 + $0x54] sm:$0xf]  ;;  %v1622_v9 = vld [vmem:[%s2143_s28 + $0x58] sm:$0xf0]  ;;  %v1742_v16 = vld [vmem:[%s2143_s28 + $0x148] sm:$0xf0] }
  0x1f   : > { %v1628_v18 = vld [vmem:[%s2143_s28 + $0x60] sm:$0xf]  ;;  %v1915_v19 = vld [vmem:[%s2143_s28 + $0x64] sm:$0xf0]  ;;  %v1748_v24 = vld [vmem:[%s2143_s28 + $0x150] sm:$0xf] }
  0x20   : > { %v1629_v22 = vor.u32 %v1915_v19, %v1628_v18  ;;  %v1945_v25 = vld [vmem:[%s2143_s28 + $0x154] sm:$0xf0]  ;;  %v1750_v28 = vld [vmem:[%s2143_s28 + $0x158] sm:$0xf0]  ;;  %v1636_v30 = vld [vmem:[%s2143_s28 + $0x70] sm:$0xf] }
  0x21   : > { %794 = vmatpush.bf16.msra.mxu0 %v1968_v10  ;;  %1987 = vmatpush.bf16.msra.mxu2 %v1968_v10  ;;  %v1621_v10 = vor.u32 %v1913_v7, %v1620_v6  ;;  %v1916_v32 = vld [vmem:[%s2143_s28 + $0x74] sm:$0xf]  ;;  %v1756_v36 = vld [vmem:[%s2143_s28 + $0x160] sm:$0xf]  ;;  %v1947_v37 = vld [vmem:[%s2143_s28 + $0x164] sm:$0xf0] }
  0x22   : > { %963 = vmatpush.bf16.msra.mxu1 %v1976_v11  ;;  %1995 = vmatpush.bf16.msra.mxu3 %v1976_v11  ;;  %v1625_v11 = vor.u32 %v1912_v8, %v1622_v9  ;;  %v1758_v40 = vld [vmem:[%s2143_s28 + $0x168] sm:$0xf0]  ;;  %v1644_v42 = vld [vmem:[%s2143_s28 + $0x80] sm:$0xf]  ;;  %v1918_v44 = vld [vmem:[%s2143_s28 + $0x84] sm:$0xf] }
  0x23   : > { %v1949_v52 = vld [vmem:[%s2143_s28 + $0x174] sm:$0xf0]  ;;  %v1948_v53 = vld [vmem:[%s2143_s28 + $0x174] sm:$0xf]  ;;  %v1654_v2 = vld [vmem:[%s2143_s28 + $0x98] sm:$0xf0] }
  0x24   : > { %v1921_v0 = vld [vmem:[%s2143_s28 + $0x94] sm:$0xf0]  ;;  %v1920_v1 = vld [vmem:[%s2143_s28 + $0x94] sm:$0xf]  ;;  %v1772_v9 = vld [vmem:[%s2143_s28 + $0x180] sm:$0xf] }
  0x25   : > { %795 = vmatpush.bf16.msra.mxu0 %v1967_v12  ;;  %1988 = vmatpush.bf16.msra.mxu2 %v1967_v12  ;;  %v1740_v12 = vld [vmem:[%s2143_s28 + $0x140] sm:$0xf] }
  0x26   : > { %964 = vmatpush.bf16.msra.mxu1 %v1975_v13  ;;  %1996 = vmatpush.bf16.msra.mxu3 %v1975_v13  ;;  %v1943_v13 = vld [vmem:[%s2143_s28 + $0x144] sm:$0xf0] }
  0x29   : > { %796 = vmatpush.bf16.msra.mxu0 %v1966_v14  ;;  %1989 = vmatpush.bf16.msra.mxu2 %v1966_v14  ;;  %v1942_v14 = vld [vmem:[%s2143_s28 + $0x144] sm:$0xf] }
  0x2a   : > { %965 = vmatpush.bf16.msra.mxu1 %v1974_v15  ;;  %1997 = vmatpush.bf16.msra.mxu3 %v1974_v15  ;;  %v1741_v15 = vor.u32 %v1943_v13, %v1740_v12  ;;  %v1745_v17 = vor.u32 %v1942_v14, %v1742_v16 }
  0x2c   : > { %797 = vmatmul.bf16.vlgmr.msra.gmra.mxu0 %v1581_v20  ;;  %877 = vmatmul.bf16.vlgmr.msra.gmra.mxu2 %v1709_v31  ;;  %v1914_v20 = vld [vmem:[%s2143_s28 + $0x64] sm:$0xf]  ;;  %v1917_v31 = vld [vmem:[%s2143_s28 + $0x74] sm:$0xf0] }
  0x2d   : > { %966 = vmatmul.bf16.vlgmr.msra.gmra.mxu1 %v1585_v21  ;;  %1046 = vmatmul.bf16.vlgmr.msra.gmra.mxu3 %v1713_v33  ;;  %v1630_v21 = vld [vmem:[%s2143_s28 + $0x68] sm:$0xf0]  ;;  %v1638_v33 = vld [vmem:[%s2143_s28 + $0x78] sm:$0xf0]  ;;  %v1637_v34 = vor.u32 %v1917_v31, %v1636_v30 }
  0x2e   : > { %v1633_v23 = vor.u32 %v1914_v20, %v1630_v21  ;;  %v1641_v35 = vor.u32 %v1916_v32, %v1638_v33 }
  0x3c   : > { %802 = vmatmul.bf16.gmra.mxu0 %v1589_v26  ;;  %882 = vmatmul.bf16.gmra.mxu2 %v1717_v43  ;;  %v1944_v26 = vld [vmem:[%s2143_s28 + $0x154] sm:$0xf]  ;;  %v1919_v43 = vld [vmem:[%s2143_s28 + $0x84] sm:$0xf0] }
  0x3d   : > { %971 = vmatmul.bf16.gmra.mxu1 %v1593_v27  ;;  %1051 = vmatmul.bf16.gmra.mxu3 %v1721_v45  ;;  %v1749_v27 = vor.u32 %v1945_v25, %v1748_v24  ;;  %v1753_v29 = vor.u32 %v1944_v26, %v1750_v28  ;;  %v1646_v45 = vld [vmem:[%s2143_s28 + $0x88] sm:$0xf0]  ;;  %v1645_v46 = vor.u32 %v1919_v43, %v1644_v42  ;;  %v1660_v25 = vld [vmem:[%s2143_s28 + $0xa0] sm:$0xf]  ;;  %v1923_v26 = vld [vmem:[%s2143_s28 + $0xa4] sm:$0xf0] }
  0x3e   : > { %v1649_v47 = vor.u32 %v1918_v44, %v1646_v45  ;;  %v1662_v28 = vld [vmem:[%s2143_s28 + $0xa8] sm:$0xf0]  ;;  %v1661_v31 = vor.u32 %v1923_v26, %v1660_v25  ;;  %v1782_v45 = vld [vmem:[%s2143_s28 + $0x198] sm:$0xf0] }
  0x4c   : > { %807 = vmatmul.bf16.gmra.mxu0 %v1597_v38  ;;  %887 = vmatmul.bf16.gmra.mxu2 %v1725_v55  ;;  %v1946_v38 = vld [vmem:[%s2143_s28 + $0x164] sm:$0xf]  ;;  %v1766_v55 = vld [vmem:[%s2143_s28 + $0x178] sm:$0xf0] }
  0x4d   : > { %976 = vmatmul.bf16.gmra.mxu1 %v1601_v39  ;;  %1056 = vmatmul.bf16.gmra.mxu3 %v1729_v57  ;;  %v1757_v39 = vor.u32 %v1947_v37, %v1756_v36  ;;  %v1761_v41 = vor.u32 %v1946_v38, %v1758_v40  ;;  %v1769_v56 = vor.u32 %v1948_v53, %v1766_v55  ;;  %v1953_v40 = vld [vmem:[%s2143_s28 + $0x194] sm:$0xf0]  ;;  %v1668_v55 = vld [vmem:[%s2143_s28 + $0xb0] sm:$0xf] }
  0x5c   : > { %812 = vmatmul.bf16.gmra.mxu0 %v1605_v50  ;;  %892 = vmatmul.bf16.gmra.mxu2 %v1733_v3 }
  0x5d   : > { %981 = vmatmul.bf16.gmra.mxu1 %v1609_v51  ;;  %1061 = vmatmul.bf16.gmra.mxu3 %v1737_v5  ;;  %v1764_v51 = vld [vmem:[%s2143_s28 + $0x170] sm:$0xf]  ;;  %v1657_v5 = vor.u32 %v1920_v1, %v1654_v2 }
  0x5e   : > { %v1765_v54 = vor.u32 %v1949_v52, %v1764_v51 }
  0x6c   : > { %817 = vmatmul.bf16.gmra.mxu0 %v1613_v62  ;;  %897 = vmatmul.bf16.gmra.mxu2 %v1741_v15  ;;  %v1774_v15 = vld [vmem:[%s2143_s28 + $0x188] sm:$0xf0] }
  0x6d   : > { %986 = vmatmul.bf16.gmra.mxu1 %v1617_v63  ;;  %1066 = vmatmul.bf16.gmra.mxu3 %v1745_v17  ;;  %v1652_v63 = vld [vmem:[%s2143_s28 + $0x90] sm:$0xf] }
  0x6e   : > { %v1653_v4 = vor.u32 %v1921_v0, %v1652_v63 }
  0x7c   : > { %822 = vmatmul.bf16.gmra.mxu0 %v1621_v10  ;;  %902 = vmatmul.bf16.gmra.mxu2 %v1749_v27  ;;  %v1951_v10 = vld [vmem:[%s2143_s28 + $0x184] sm:$0xf0]  ;;  %v1922_v27 = vld [vmem:[%s2143_s28 + $0xa4] sm:$0xf] }
  0x7d   : > { %991 = vmatmul.bf16.gmra.mxu1 %v1625_v11  ;;  %1071 = vmatmul.bf16.gmra.mxu3 %v1753_v29  ;;  %v1950_v11 = vld [vmem:[%s2143_s28 + $0x184] sm:$0xf]  ;;  %v1773_v14 = vor.u32 %v1951_v10, %v1772_v9  ;;  %v1665_v32 = vor.u32 %v1922_v27, %v1662_v28 }
  0x7e   : > { %v1777_v16 = vor.u32 %v1950_v11, %v1774_v15  ;;  %v1790_v11 = vld [vmem:[%s2143_s28 + $0x1a8] sm:$0xf0] }
  0x8c   : > { %827 = vmatmul.bf16.gmra.mxu0 %v1629_v22  ;;  %907 = vmatmul.bf16.gmra.mxu2 %v1757_v39  ;;  %v1780_v39 = vld [vmem:[%s2143_s28 + $0x190] sm:$0xf] }
  0x8d   : > { %996 = vmatmul.bf16.gmra.mxu1 %v1633_v23  ;;  %1076 = vmatmul.bf16.gmra.mxu3 %v1761_v41  ;;  %v1952_v41 = vld [vmem:[%s2143_s28 + $0x194] sm:$0xf]  ;;  %v1781_v44 = vor.u32 %v1953_v40, %v1780_v39 }
  0x8e   : > { %v1956_v39 = vld [vmem:[%s2143_s28 + $0x1b4] sm:$0xf] }
  0x9c   : > { %832 = vmatmul.bf16.gmra.mxu0 %v1637_v34  ;;  %912 = vmatmul.bf16.gmra.mxu2 %v1765_v54 }
  0x9d   : > { %1001 = vmatmul.bf16.gmra.mxu1 %v1641_v35  ;;  %1081 = vmatmul.bf16.gmra.mxu3 %v1769_v56  ;;  %v1925_v56 = vld [vmem:[%s2143_s28 + $0xb4] sm:$0xf0] }
  0xa9   : > { %v798_v48 = vpop.f32.mrf.mxu0 }
  0xaa   : > { %v967_v49 = vpop.f32.mrf.mxu1 }
  0xab   : > { %v968_v50 = vadd.f32 %v967_v49, %v798_v48 }
  0xac   : > { %837 = vmatmul.bf16.gmra.mxu0 %v1645_v46  ;;  %917 = vmatmul.bf16.gmra.mxu2 %v1773_v14  ;;  %v1785_v46 = vor.u32 %v1952_v41, %v1782_v45 }
  0xad   : > { %1127 = vst [vmem:[%s2220_s9] sm:$0xff] %v968_v50  ;;  %1006 = vmatmul.bf16.gmra.mxu1 %v1649_v47  ;;  %v1260_v60 = vmul.f32 %v968_v50, %v968_v50  ;;  %1086 = vmatmul.bf16.gmra.mxu3 %v1777_v16 }
  0xaf   : > { %v878_v21 = vpop.f32.mrf.mxu2 }
  0xb0   : > { %v1047_v22 = vpop.f32.mrf.mxu3 }
  0xb1   : > { %v800_v57 = vpop.f32.mrf.mxu0  ;;  %v2242_v30 = vadd.f32 %v1047_v22, %v878_v21  ;;  %v1676_v21 = vld [vmem:[%s2143_s28 + $0xc0] sm:$0xf]  ;;  %v1927_v22 = vld [vmem:[%s2143_s28 + $0xc4] sm:$0xf0] }
  0xb2   : > { %v969_v58 = vpop.f32.mrf.mxu1  ;;  %v1677_v27 = vor.u32 %v1927_v22, %v1676_v21  ;;  %v1692_v21 = vld [vmem:[%s2143_s28 + $0xe0] sm:$0xf]  ;;  %v1931_v22 = vld [vmem:[%s2143_s28 + $0xe4] sm:$0xf0] }
  0xb3   : > { %v970_v59 = vadd.f32 %v969_v58, %v800_v57  ;;  %1159 = vst [vmem:[%s2220_s9 + $0x100] sm:$0xff] %v2242_v30  ;;  %v1924_v57 = vld [vmem:[%s2143_s28 + $0xb4] sm:$0xf]  ;;  %v1670_v58 = vld [vmem:[%s2143_s28 + $0xb8] sm:$0xf0] }
  0xb5   : > { %1128 = vst [vmem:[%s2220_s9 + $0x8] sm:$0xff] %v970_v59  ;;  %v1191_v61 = vadd.f32 %v970_v59, %v968_v50  ;;  %v1261_v62 = vmul.f32 %v970_v59, %v970_v59 }
  0xb7   : > { %v1324_v3 = vadd.f32 %v1261_v62, %v1260_v60  ;;  %v880_v36 = vpop.f32.mrf.mxu2  ;;  %v1673_v62 = vor.u32 %v1924_v57, %v1670_v58 }
  0xb8   : > { %v1049_v37 = vpop.f32.mrf.mxu3 }
  0xb9   : > { %v803_v6 = vpop.f32.mrf.mxu0  ;;  %v2246_v38 = vadd.f32 %v1049_v37, %v880_v36  ;;  %v1796_v36 = vld [vmem:[%s2143_s28 + $0x1b0] sm:$0xf]  ;;  %v1957_v37 = vld [vmem:[%s2143_s28 + $0x1b4] sm:$0xf0] }
  0xba   : > { %v972_v7 = vpop.f32.mrf.mxu1 }
  0xbb   : > { %v973_v8 = vadd.f32 %v972_v7, %v803_v6  ;;  %1160 = vst [vmem:[%s2220_s9 + $0x108] sm:$0xff] %v2246_v38  ;;  %v1955_v6 = vld [vmem:[%s2143_s28 + $0x1a4] sm:$0xf0]  ;;  %v1954_v7 = vld [vmem:[%s2143_s28 + $0x1a4] sm:$0xf] }
  0xbc   : > { %842 = vmatmul.bf16.gmra.mxu0 %v1653_v4  ;;  %922 = vmatmul.bf16.gmra.mxu2 %v1781_v44 }
  0xbd   : > { %1129 = vst [vmem:[%s2220_s9 + $0x10] sm:$0xff] %v973_v8  ;;  %v1192_v12 = vadd.f32 %v1191_v61, %v973_v8  ;;  %v1262_v13 = vmul.f32 %v973_v8, %v973_v8  ;;  %1011 = vmatmul.bf16.gmra.mxu1 %v1657_v5  ;;  %1091 = vmatmul.bf16.gmra.mxu3 %v1785_v46  ;;  %v1788_v5 = vld [vmem:[%s2143_s28 + $0x1a0] sm:$0xf] }
  0xbe   : > { %v1669_v61 = vor.u32 %v1925_v56, %v1668_v55  ;;  %v1789_v10 = vor.u32 %v1955_v6, %v1788_v5  ;;  %v1928_v55 = vld [vmem:[%s2143_s28 + $0xd4] sm:$0xf]  ;;  %v1686_v56 = vld [vmem:[%s2143_s28 + $0xd8] sm:$0xf0]  ;;  %v1804_v5 = vld [vmem:[%s2143_s28 + $0x1c0] sm:$0xf] }
  0xbf   : > { %v1325_v17 = vadd.f32 %v1324_v3, %v1262_v13  ;;  %v883_v51 = vpop.f32.mrf.mxu2  ;;  %v1959_v6 = vld [vmem:[%s2143_s28 + $0x1c4] sm:$0xf0] }
  0xc0   : > { %v1052_v52 = vpop.f32.mrf.mxu3 }
  0xc1   : > { %v805_v18 = vpop.f32.mrf.mxu0  ;;  %v2260_v60 = vadd.f32 %v1052_v52, %v883_v51 }
  0xc2   : > { %v974_v19 = vpop.f32.mrf.mxu1 }
  0xc3   : > { %v975_v20 = vadd.f32 %v974_v19, %v805_v18  ;;  %1161 = vst [vmem:[%s2220_s9 + $0x110] sm:$0xff] %v2260_v60 }
  0xc5   : > { %1130 = vst [vmem:[%s2220_s9 + $0x18] sm:$0xff] %v975_v20  ;;  %v1193_v23 = vadd.f32 %v1192_v12, %v975_v20  ;;  %v1263_v24 = vmul.f32 %v975_v20, %v975_v20  ;;  %v1793_v12 = vor.u32 %v1954_v7, %v1790_v11  ;;  %v1958_v7 = vld [vmem:[%s2143_s28 + $0x1c4] sm:$0xf]  ;;  %v1806_v11 = vld [vmem:[%s2143_s28 + $0x1c8] sm:$0xf0] }
  0xc7   : > { %v1326_v29 = vadd.f32 %v1325_v17, %v1263_v24  ;;  %v885_v2 = vpop.f32.mrf.mxu2  ;;  %v1678_v24 = vld [vmem:[%s2143_s28 + $0xc8] sm:$0xf0] }
  0xc8   : > { %v1054_v3 = vpop.f32.mrf.mxu3 }
  0xc9   : > { %v808_v33 = vpop.f32.mrf.mxu0  ;;  %v2264_v4 = vadd.f32 %v1054_v3, %v885_v2 }
  0xca   : > { %v977_v34 = vpop.f32.mrf.mxu1 }
  0xcb   : > { %v978_v35 = vadd.f32 %v977_v34, %v808_v33  ;;  %1162 = vst [vmem:[%s2220_s9 + $0x118] sm:$0xff] %v2264_v4 }
  0xcc   : > { %847 = vmatmul.bf16.gmra.mxu0 %v1661_v31  ;;  %927 = vmatmul.bf16.gmra.mxu2 %v1789_v10  ;;  %v1805_v10 = vor.u32 %v1959_v6, %v1804_v5 }
  0xcd   : > { %1131 = vst [vmem:[%s2220_s9 + $0x20] sm:$0xff] %v978_v35  ;;  %v1194_v42 = vadd.f32 %v1193_v23, %v978_v35  ;;  %v1264_v43 = vmul.f32 %v978_v35, %v978_v35  ;;  %1016 = vmatmul.bf16.gmra.mxu1 %v1665_v32  ;;  %1096 = vmatmul.bf16.gmra.mxu3 %v1793_v12  ;;  %v1926_v23 = vld [vmem:[%s2143_s28 + $0xc4] sm:$0xf] }
  0xce   : > { %v1681_v28 = vor.u32 %v1926_v23, %v1678_v24  ;;  %v1809_v12 = vor.u32 %v1958_v7, %v1806_v11  ;;  %v1930_v23 = vld [vmem:[%s2143_s28 + $0xe4] sm:$0xf]  ;;  %v1694_v24 = vld [vmem:[%s2143_s28 + $0xe8] sm:$0xf0] }
  0xcf   : > { %v1327_v47 = vadd.f32 %v1326_v29, %v1264_v43  ;;  %v888_v17 = vpop.f32.mrf.mxu2  ;;  %v1798_v43 = vld [vmem:[%s2143_s28 + $0x1b8] sm:$0xf0]  ;;  %v1962_v11 = vld [vmem:[%s2143_s28 + $0x1e4] sm:$0xf] }
  0xd0   : > { %v1057_v18 = vpop.f32.mrf.mxu3  ;;  %v1801_v44 = vor.u32 %v1956_v39, %v1798_v43  ;;  %v1812_v39 = vld [vmem:[%s2143_s28 + $0x1d0] sm:$0xf] }
  0xd1   : > { %v810_v48 = vpop.f32.mrf.mxu0  ;;  %v2278_v26 = vadd.f32 %v1057_v18, %v888_v17 }
  0xd2   : > { %v979_v49 = vpop.f32.mrf.mxu1 }
  0xd3   : > { %v980_v50 = vadd.f32 %v979_v49, %v810_v48  ;;  %1163 = vst [vmem:[%s2220_s9 + $0x120] sm:$0xff] %v2278_v26 }
  0xd5   : > { %1132 = vst [vmem:[%s2220_s9 + $0x28] sm:$0xff] %v980_v50  ;;  %v1195_v53 = vadd.f32 %v1194_v42, %v980_v50  ;;  %v1265_v54 = vmul.f32 %v980_v50, %v980_v50  ;;  %v1797_v42 = vor.u32 %v1957_v37, %v1796_v36 }
  0xd7   : > { %v1328_v59 = vadd.f32 %v1327_v47, %v1265_v54  ;;  %v890_v33 = vpop.f32.mrf.mxu2  ;;  %v1929_v54 = vld [vmem:[%s2143_s28 + $0xd4] sm:$0xf0] }
  0xd8   : > { %v1059_v34 = vpop.f32.mrf.mxu3 }
  0xd9   : > { %v813_v63 = vpop.f32.mrf.mxu0  ;;  %v2282_v35 = vadd.f32 %v1059_v34, %v890_v33 }
  0xda   : > { %v982_v0 = vpop.f32.mrf.mxu1 }
  0xdb   : > { %v983_v1 = vadd.f32 %v982_v0, %v813_v63  ;;  %1164 = vst [vmem:[%s2220_s9 + $0x128] sm:$0xff] %v2282_v35 }
  0xdc   : > { %852 = vmatmul.bf16.gmra.mxu0 %v1669_v61  ;;  %932 = vmatmul.bf16.gmra.mxu2 %v1797_v42  ;;  %v1689_v61 = vor.u32 %v1928_v55, %v1686_v56  ;;  %v1700_v55 = vld [vmem:[%s2143_s28 + $0xf0] sm:$0xf]  ;;  %v1933_v56 = vld [vmem:[%s2143_s28 + $0xf4] sm:$0xf0] }
  0xdd   : > { %1133 = vst [vmem:[%s2220_s9 + $0x30] sm:$0xff] %v983_v1  ;;  %v1196_v8 = vadd.f32 %v1195_v53, %v983_v1  ;;  %v1266_v9 = vmul.f32 %v983_v1, %v983_v1  ;;  %1021 = vmatmul.bf16.gmra.mxu1 %v1673_v62  ;;  %1101 = vmatmul.bf16.gmra.mxu3 %v1801_v44  ;;  %v1684_v53 = vld [vmem:[%s2143_s28 + $0xd0] sm:$0xf] }
  0xdf   : > { %v1329_v13 = vadd.f32 %v1328_v59, %v1266_v9  ;;  %v893_v49 = vpop.f32.mrf.mxu2  ;;  %v1685_v59 = vor.u32 %v1929_v54, %v1684_v53 }
  0xe0   : > { %v1062_v50 = vpop.f32.mrf.mxu3 }
  0xe1   : > { %v815_v14 = vpop.f32.mrf.mxu0  ;;  %v2296_v58 = vadd.f32 %v1062_v50, %v893_v49 }
  0xe2   : > { %v984_v15 = vpop.f32.mrf.mxu1 }
  0xe3   : > { %v985_v16 = vadd.f32 %v984_v15, %v815_v14  ;;  %1165 = vst [vmem:[%s2220_s9 + $0x130] sm:$0xff] %v2296_v58 }
  0xe5   : > { %1134 = vst [vmem:[%s2220_s9 + $0x38] sm:$0xff] %v985_v16  ;;  %v1197_v19 = vadd.f32 %v1196_v8, %v985_v16  ;;  %v1267_v20 = vmul.f32 %v985_v16, %v985_v16 }
  0xe7   : > { %v1330_v25 = vadd.f32 %v1329_v13, %v1267_v20  ;;  %v895_v1 = vpop.f32.mrf.mxu2 }
  0xe8   : > { %v1064_v2 = vpop.f32.mrf.mxu3 }
  0xe9   : > { %v818_v29 = vpop.f32.mrf.mxu0  ;;  %v2300_v3 = vadd.f32 %v1064_v2, %v895_v1 }
  0xea   : > { %v987_v31 = vpop.f32.mrf.mxu1 }
  0xeb   : > { %v988_v32 = vadd.f32 %v987_v31, %v818_v29  ;;  %1166 = vst [vmem:[%s2220_s9 + $0x138] sm:$0xff] %v2300_v3  ;;  %v1697_v29 = vor.u32 %v1930_v23, %v1694_v24 }
  0xec   : > { %857 = vmatmul.bf16.gmra.mxu0 %v1677_v27  ;;  %937 = vmatmul.bf16.gmra.mxu2 %v1805_v10  ;;  %v1963_v10 = vld [vmem:[%s2143_s28 + $0x1e4] sm:$0xf0] }
  0xed   : > { %1135 = vst [vmem:[%s2220_s9 + $0x40] sm:$0xff] %v988_v32  ;;  %v1198_v40 = vadd.f32 %v1197_v19, %v988_v32  ;;  %v1268_v41 = vmul.f32 %v988_v32, %v988_v32  ;;  %1026 = vmatmul.bf16.gmra.mxu1 %v1681_v28  ;;  %1106 = vmatmul.bf16.gmra.mxu3 %v1809_v12 }
  0xee   : > { %v1693_v28 = vor.u32 %v1931_v22, %v1692_v21 }
  0xef   : > { %v1331_v45 = vadd.f32 %v1330_v25, %v1268_v41  ;;  %v898_v17 = vpop.f32.mrf.mxu2  ;;  %v1960_v41 = vld [vmem:[%s2143_s28 + $0x1d4] sm:$0xf] }
  0xf0   : > { %v1067_v18 = vpop.f32.mrf.mxu3 }
  0xf1   : > { %v820_v46 = vpop.f32.mrf.mxu0  ;;  %v2314_v27 = vadd.f32 %v1067_v18, %v898_v17 }
  0xf2   : > { %v989_v47 = vpop.f32.mrf.mxu1 }
  0xf3   : > { %v990_v48 = vadd.f32 %v989_v47, %v820_v46  ;;  %1167 = vst [vmem:[%s2220_s9 + $0x140] sm:$0xff] %v2314_v27 }
  0xf5   : > { %1136 = vst [vmem:[%s2220_s9 + $0x48] sm:$0xff] %v990_v48  ;;  %v1199_v51 = vadd.f32 %v1198_v40, %v990_v48  ;;  %v1269_v52 = vmul.f32 %v990_v48, %v990_v48  ;;  %v1961_v40 = vld [vmem:[%s2143_s28 + $0x1d4] sm:$0xf0] }
  0xf6   : > { %v1813_v44 = vor.u32 %v1961_v40, %v1812_v39  ;;  %v1828_v39 = vld [vmem:[%s2143_s28 + $0x1f0] sm:$0xf]  ;;  %v1965_v40 = vld [vmem:[%s2143_s28 + $0x1f4] sm:$0xf0] }
  0xf7   : > { %v1332_v57 = vadd.f32 %v1331_v45, %v1269_v52  ;;  %v900_v34 = vpop.f32.mrf.mxu2  ;;  %v1814_v45 = vld [vmem:[%s2143_s28 + $0x1d8] sm:$0xf0] }
  0xf8   : > { %v1069_v36 = vpop.f32.mrf.mxu3  ;;  %v1817_v46 = vor.u32 %v1960_v41, %v1814_v45  ;;  %v1964_v41 = vld [vmem:[%s2143_s28 + $0x1f4] sm:$0xf]  ;;  %v1830_v45 = vld [vmem:[%s2143_s28 + $0x1f8] sm:$0xf0] }
  0xf9   : > { %v823_v62 = vpop.f32.mrf.mxu0  ;;  %v2318_v37 = vadd.f32 %v1069_v36, %v900_v34 }
  0xfa   : > { %v992_v63 = vpop.f32.mrf.mxu1 }
  0xfb   : > { %v993_v0 = vadd.f32 %v992_v63, %v823_v62  ;;  %1168 = vst [vmem:[%s2220_s9 + $0x148] sm:$0xff] %v2318_v37  ;;  %v1701_v63 = vor.u32 %v1933_v56, %v1700_v55 }
  0xfc   : > { %862 = vmatmul.bf16.gmra.mxu0 %v1685_v59  ;;  %942 = vmatmul.bf16.gmra.mxu2 %v1813_v44  ;;  %v1702_v59 = vld [vmem:[%s2143_s28 + $0xf8] sm:$0xf0]  ;;  %v1829_v44 = vor.u32 %v1965_v40, %v1828_v39 }
  0xfd   : > { %1137 = vst [vmem:[%s2220_s9 + $0x50] sm:$0xff] %v993_v0  ;;  %v1200_v8 = vadd.f32 %v1199_v51, %v993_v0  ;;  %v1270_v9 = vmul.f32 %v993_v0, %v993_v0  ;;  %1031 = vmatmul.bf16.gmra.mxu1 %v1689_v61  ;;  %1111 = vmatmul.bf16.gmra.mxu3 %v1817_v46 }
  0xfe   : > { %v1833_v46 = vor.u32 %v1964_v41, %v1830_v45 }
  0xff   : > { %v1333_v13 = vadd.f32 %v1332_v57, %v1270_v9  ;;  %v903_v51 = vpop.f32.mrf.mxu2  ;;  %v1932_v57 = vld [vmem:[%s2143_s28 + $0xf4] sm:$0xf]  ;;  %v1820_v9 = vld [vmem:[%s2143_s28 + $0x1e0] sm:$0xf] }
 0x100   : > { %v1072_v52 = vpop.f32.mrf.mxu3  ;;  %v1705_v0 = vor.u32 %v1932_v57, %v1702_v59 }
 0x101   : > { %v825_v14 = vpop.f32.mrf.mxu0  ;;  %v2332_v62 = vadd.f32 %v1072_v52, %v903_v51 }
 0x102   : > { %v994_v15 = vpop.f32.mrf.mxu1 }
 0x103   : > { %v995_v16 = vadd.f32 %v994_v15, %v825_v14  ;;  %1169 = vst [vmem:[%s2220_s9 + $0x150] sm:$0xff] %v2332_v62  ;;  %v1821_v14 = vor.u32 %v1963_v10, %v1820_v9  ;;  %v1822_v15 = vld [vmem:[%s2143_s28 + $0x1e8] sm:$0xf0] }
 0x105   : > { %1138 = vst [vmem:[%s2220_s9 + $0x58] sm:$0xff] %v995_v16  ;;  %v1201_v19 = vadd.f32 %v1200_v8, %v995_v16  ;;  %v1271_v20 = vmul.f32 %v995_v16, %v995_v16  ;;  %v1825_v16 = vor.u32 %v1962_v11, %v1822_v15 }
 0x107   : > { %v1334_v25 = vadd.f32 %v1333_v13, %v1271_v20  ;;  %v905_v6 = vpop.f32.mrf.mxu2 }
 0x108   : > { %v1074_v7 = vpop.f32.mrf.mxu3 }
 0x109   : > { %v828_v31 = vpop.f32.mrf.mxu0  ;;  %v2336_v8 = vadd.f32 %v1074_v7, %v905_v6 }
 0x10a   : > { %v997_v32 = vpop.f32.mrf.mxu1 }
 0x10b   : > { %v998_v33 = vadd.f32 %v997_v32, %v828_v31  ;;  %1170 = vst [vmem:[%s2220_s9 + $0x158] sm:$0xff] %v2336_v8 }
 0x10c   : > { %867 = vmatmul.bf16.gmra.mxu0 %v1693_v28  ;;  %947 = vmatmul.bf16.gmra.mxu2 %v1821_v14 }
 0x10d   : > { %1139 = vst [vmem:[%s2220_s9 + $0x60] sm:$0xff] %v998_v33  ;;  %v1202_v42 = vadd.f32 %v1201_v19, %v998_v33  ;;  %v1272_v43 = vmul.f32 %v998_v33, %v998_v33  ;;  %1036 = vmatmul.bf16.gmra.mxu1 %v1697_v29  ;;  %1116 = vmatmul.bf16.gmra.mxu3 %v1825_v16 }
 0x10f   : > { %v1335_v47 = vadd.f32 %v1334_v25, %v1272_v43  ;;  %v908_v21 = vpop.f32.mrf.mxu2 }
 0x110   : > { %v1077_v22 = vpop.f32.mrf.mxu3 }
 0x111   : > { %v830_v48 = vpop.f32.mrf.mxu0  ;;  %v2346_v28 = vadd.f32 %v1077_v22, %v908_v21 }
 0x112   : > { %v999_v49 = vpop.f32.mrf.mxu1 }
 0x113   : > { %v1000_v50 = vadd.f32 %v999_v49, %v830_v48  ;;  %1171 = vst [vmem:[%s2220_s9 + $0x160] sm:$0xff] %v2346_v28 }
 0x115   : > { %1140 = vst [vmem:[%s2220_s9 + $0x68] sm:$0xff] %v1000_v50  ;;  %v1203_v53 = vadd.f32 %v1202_v42, %v1000_v50  ;;  %v1273_v54 = vmul.f32 %v1000_v50, %v1000_v50 }
 0x117   : > { %v1336_v61 = vadd.f32 %v1335_v47, %v1273_v54  ;;  %v910_v33 = vpop.f32.mrf.mxu2 }
 0x118   : > { %v1079_v34 = vpop.f32.mrf.mxu3 }
 0x119   : > { %v833_v1 = vpop.f32.mrf.mxu0  ;;  %v2350_v36 = vadd.f32 %v1079_v34, %v910_v33 }
 0x11a   : > { %v1002_v2 = vpop.f32.mrf.mxu1 }
 0x11b   : > { %v1003_v5 = vadd.f32 %v1002_v2, %v833_v1  ;;  %1172 = vst [vmem:[%s2220_s9 + $0x168] sm:$0xff] %v2350_v36 }
 0x11c   : > { %872 = vmatmul.bf16.gmra.mxu0 %v1701_v63  ;;  %952 = vmatmul.bf16.gmra.mxu2 %v1829_v44 }
 0x11d   : > { %1141 = vst [vmem:[%s2220_s9 + $0x70] sm:$0xff] %v1003_v5  ;;  %v1204_v12 = vadd.f32 %v1203_v53, %v1003_v5  ;;  %v1274_v13 = vmul.f32 %v1003_v5, %v1003_v5  ;;  %1041 = vmatmul.bf16.gmra.mxu1 %v1705_v0  ;;  %1121 = vmatmul.bf16.gmra.mxu3 %v1833_v46 }
 0x11f   : > { %v1337_v17 = vadd.f32 %v1336_v61, %v1274_v13  ;;  %v913_v51 = vpop.f32.mrf.mxu2 }
 0x120   : > { %v1082_v52 = vpop.f32.mrf.mxu3 }
 0x121   : > { %v835_v18 = vpop.f32.mrf.mxu0  ;;  %v2360_v56 = vadd.f32 %v1082_v52, %v913_v51 }
 0x122   : > { %v1004_v19 = vpop.f32.mrf.mxu1 }
 0x123   : > { %v1005_v20 = vadd.f32 %v1004_v19, %v835_v18  ;;  %1173 = vst [vmem:[%s2220_s9 + $0x170] sm:$0xff] %v2360_v56 }
 0x125   : > { %1142 = vst [vmem:[%s2220_s9 + $0x78] sm:$0xff] %v1005_v20  ;;  %v1205_v23 = vadd.f32 %v1204_v12, %v1005_v20  ;;  %v1275_v24 = vmul.f32 %v1005_v20, %v1005_v20 }
 0x127   : > { %v1338_v25 = vadd.f32 %v1337_v17, %v1275_v24  ;;  %v915_v63 = vpop.f32.mrf.mxu2 }
 0x128   : > { %v1084_v0 = vpop.f32.mrf.mxu3 }
 0x129   : > { %v838_v29 = vpop.f32.mrf.mxu0  ;;  %v2364_v1 = vadd.f32 %v1084_v0, %v915_v63 }
 0x12a   : > { %v1007_v31 = vpop.f32.mrf.mxu1 }
 0x12b   : > { %v1008_v32 = vadd.f32 %v1007_v31, %v838_v29  ;;  %1174 = vst [vmem:[%s2220_s9 + $0x178] sm:$0xff] %v2364_v1 }
 0x12d   : > { %1143 = vst [vmem:[%s2220_s9 + $0x80] sm:$0xff] %v1008_v32  ;;  %v1206_v42 = vadd.f32 %v1205_v23, %v1008_v32  ;;  %v1276_v43 = vmul.f32 %v1008_v32, %v1008_v32 }
 0x12f   : > { %v1339_v47 = vadd.f32 %v1338_v25, %v1276_v43  ;;  %v918_v11 = vpop.f32.mrf.mxu2 }
 0x130   : > { %v1087_v12 = vpop.f32.mrf.mxu3 }
 0x131   : > { %v840_v48 = vpop.f32.mrf.mxu0  ;;  %v2370_v16 = vadd.f32 %v1087_v12, %v918_v11 }
 0x132   : > { %v1009_v49 = vpop.f32.mrf.mxu1 }
 0x133   : > { %v1010_v50 = vadd.f32 %v1009_v49, %v840_v48  ;;  %1175 = vst [vmem:[%s2220_s9 + $0x180] sm:$0xff] %v2370_v16 }
 0x135   : > { %1144 = vst [vmem:[%s2220_s9 + $0x88] sm:$0xff] %v1010_v50  ;;  %v1207_v53 = vadd.f32 %v1206_v42, %v1010_v50  ;;  %v1277_v54 = vmul.f32 %v1010_v50, %v1010_v50 }
 0x137   : > { %v1340_v55 = vadd.f32 %v1339_v47, %v1277_v54  ;;  %v920_v20 = vpop.f32.mrf.mxu2 }
 0x138   : > { %v1089_v21 = vpop.f32.mrf.mxu3 }
 0x139   : > { %v843_v57 = vpop.f32.mrf.mxu0  ;;  %v2374_v22 = vadd.f32 %v1089_v21, %v920_v20 }
 0x13a   : > { %v1012_v59 = vpop.f32.mrf.mxu1 }
 0x13b   : > { %v1013_v61 = vadd.f32 %v1012_v59, %v843_v57  ;;  %1176 = vst [vmem:[%s2220_s9 + $0x188] sm:$0xff] %v2374_v22 }
 0x13d   : > { %1145 = vst [vmem:[%s2220_s9 + $0x90] sm:$0xff] %v1013_v61  ;;  %v1208_v2 = vadd.f32 %v1207_v53, %v1013_v61  ;;  %v1278_v5 = vmul.f32 %v1013_v61, %v1013_v61 }
 0x13f   : > { %v1341_v6 = vadd.f32 %v1340_v55, %v1278_v5  ;;  %v923_v33 = vpop.f32.mrf.mxu2 }
 0x140   : > { %v1092_v34 = vpop.f32.mrf.mxu3 }
 0x141   : > { %v845_v7 = vpop.f32.mrf.mxu0  ;;  %v2387_v39 = vadd.f32 %v1092_v34, %v923_v33 }
 0x142   : > { %v1014_v9 = vpop.f32.mrf.mxu1 }
 0x143   : > { %v1015_v10 = vadd.f32 %v1014_v9, %v845_v7  ;;  %1177 = vst [vmem:[%s2220_s9 + $0x190] sm:$0xff] %v2387_v39 }
 0x145   : > { %1146 = vst [vmem:[%s2220_s9 + $0x98] sm:$0xff] %v1015_v10  ;;  %v1209_v13 = vadd.f32 %v1208_v2, %v1015_v10  ;;  %v1279_v14 = vmul.f32 %v1015_v10, %v1015_v10 }
 0x147   : > { %v1342_v15 = vadd.f32 %v1341_v6, %v1279_v14  ;;  %v925_v43 = vpop.f32.mrf.mxu2 }
 0x148   : > { %v1094_v44 = vpop.f32.mrf.mxu3 }
 0x149   : > { %v848_v17 = vpop.f32.mrf.mxu0  ;;  %v2391_v45 = vadd.f32 %v1094_v44, %v925_v43 }
 0x14a   : > { %v1017_v18 = vpop.f32.mrf.mxu1 }
 0x14b   : > { %v1018_v19 = vadd.f32 %v1017_v18, %v848_v17  ;;  %1178 = vst [vmem:[%s2220_s9 + $0x198] sm:$0xff] %v2391_v45 }
 0x14d   : > { %1147 = vst [vmem:[%s2220_s9 + $0xa0] sm:$0xff] %v1018_v19  ;;  %v2377_v23 = vadd.f32 %v1209_v13, %v1018_v19  ;;  %v1280_v24 = vmul.f32 %v1018_v19, %v1018_v19 }
 0x14f   : > { %v2381_v25 = vadd.f32 %v1342_v15, %v1280_v24  ;;  %v928_v49 = vpop.f32.mrf.mxu2 }
 0x150   : > { %v1097_v50 = vpop.f32.mrf.mxu3 }
 0x151   : > { %v850_v29 = vpop.f32.mrf.mxu0  ;;  %v2397_v51 = vadd.f32 %v1097_v50, %v928_v49 }
 0x152   : > { %v1019_v31 = vpop.f32.mrf.mxu1 }
 0x153   : > { %v2383_v32 = vadd.f32 %v1019_v31, %v850_v29  ;;  %1179 = vst [vmem:[%s2220_s9 + $0x1a0] sm:$0xff] %v2397_v51 }
 0x155   : > { %1148 = vst [vmem:[%s2220_s9 + $0xa8] sm:$0xff] %v2383_v32  ;;  %v1211_v43 = vadd.f32 %v2377_v23, %v2383_v32 }
 0x157   : > { %v930_v55 = vpop.f32.mrf.mxu2 }
 0x158   : > { %v1099_v57 = vpop.f32.mrf.mxu3 }
 0x159   : > { %v853_v40 = vpop.f32.mrf.mxu0  ;;  %v2401_v59 = vadd.f32 %v1099_v57, %v930_v55 }
 0x15a   : > { %v1022_v41 = vpop.f32.mrf.mxu1 }
 0x15b   : > { %v1023_v42 = vadd.f32 %v1022_v41, %v853_v40  ;;  %1180 = vst [vmem:[%s2220_s9 + $0x1a8] sm:$0xff] %v2401_v59  ;;  %v1281_v40 = vmul.f32 %v2383_v32, %v2383_v32 }
 0x15d   : > { %1149 = vst [vmem:[%s2220_s9 + $0xb0] sm:$0xff] %v1023_v42  ;;  %v1282_v41 = vmul.f32 %v1023_v42, %v1023_v42  ;;  %v1344_v44 = vadd.f32 %v2381_v25, %v1281_v40  ;;  %v1212_v50 = vadd.f32 %v1211_v43, %v1023_v42 }
 0x15f   : > { %v933_v2 = vpop.f32.mrf.mxu2  ;;  %v1345_v57 = vadd.f32 %v1344_v44, %v1282_v41 }
 0x160   : > { %v1102_v5 = vpop.f32.mrf.mxu3 }
 0x161   : > { %v855_v46 = vpop.f32.mrf.mxu0  ;;  %v2407_v6 = vadd.f32 %v1102_v5, %v933_v2 }
 0x162   : > { %v1024_v47 = vpop.f32.mrf.mxu1 }
 0x163   : > { %v1025_v48 = vadd.f32 %v1024_v47, %v855_v46  ;;  %1181 = vst [vmem:[%s2220_s9 + $0x1b0] sm:$0xff] %v2407_v6 }
 0x165   : > { %1150 = vst [vmem:[%s2220_s9 + $0xb8] sm:$0xff] %v1025_v48  ;;  %v1283_v46 = vmul.f32 %v1025_v48, %v1025_v48 }
 0x167   : > { %v935_v11 = vpop.f32.mrf.mxu2  ;;  %v1346_v2 = vadd.f32 %v1345_v57, %v1283_v46 }
 0x168   : > { %v1104_v12 = vpop.f32.mrf.mxu3 }
 0x169   : > { %v858_v52 = vpop.f32.mrf.mxu0  ;;  %v2411_v13 = vadd.f32 %v1104_v12, %v935_v11 }
 0x16a   : > { %v1027_v53 = vpop.f32.mrf.mxu1 }
 0x16b   : > { %v1028_v54 = vadd.f32 %v1027_v53, %v858_v52  ;;  %1182 = vst [vmem:[%s2220_s9 + $0x1b8] sm:$0xff] %v2411_v13 }
 0x16d   : > { %1151 = vst [vmem:[%s2220_s9 + $0xc0] sm:$0xff] %v1028_v54 }
 0x16f   : > { %v938_v18 = vpop.f32.mrf.mxu2 }
 0x170   : > { %v1107_v19 = vpop.f32.mrf.mxu3 }
 0x171   : > { %v860_v61 = vpop.f32.mrf.mxu0  ;;  %v2417_v29 = vadd.f32 %v1107_v19, %v938_v18 }
 0x172   : > { %v1029_v63 = vpop.f32.mrf.mxu1 }
 0x173   : > { %v1030_v0 = vadd.f32 %v1029_v63, %v860_v61  ;;  %1183 = vst [vmem:[%s2220_s9 + $0x1c0] sm:$0xff] %v2417_v29  ;;  %v1284_v61 = vmul.f32 %v1028_v54, %v1028_v54  ;;  %v1213_v63 = vadd.f32 %v1212_v50, %v1025_v48 }
 0x175   : > { %1152 = vst [vmem:[%s2220_s9 + $0xc8] sm:$0xff] %v1030_v0  ;;  %v1285_v5 = vmul.f32 %v1030_v0, %v1030_v0 }
 0x177   : > { %v940_v31 = vpop.f32.mrf.mxu2 }
 0x178   : > { %v1109_v33 = vpop.f32.mrf.mxu3 }
 0x179   : > { %v863_v7 = vpop.f32.mrf.mxu0  ;;  %v2419_v34 = vadd.f32 %v1109_v33, %v940_v31 }
 0x17a   : > { %v1032_v9 = vpop.f32.mrf.mxu1 }
 0x17b   : > { %v1033_v10 = vadd.f32 %v1032_v9, %v863_v7  ;;  %1184 = vst [vmem:[%s2220_s9 + $0x1c8] sm:$0xff] %v2419_v34  ;;  %v1214_v7 = vadd.f32 %v1213_v63, %v1028_v54  ;;  %v1347_v9 = vadd.f32 %v1346_v2, %v1284_v61  ;;  %v1293_v2 = vmul.f32 %v2246_v38, %v2246_v38 }
 0x17d   : > { %1153 = vst [vmem:[%s2220_s9 + $0xd0] sm:$0xff] %v1033_v10  ;;  %v1215_v11 = vadd.f32 %v1214_v7, %v1030_v0  ;;  %v1286_v23 = vmul.f32 %v1033_v10, %v1033_v10  ;;  %v1348_v25 = vadd.f32 %v1347_v9, %v1285_v5  ;;  %v1294_v9 = vmul.f32 %v2260_v60, %v2260_v60 }
 0x17f   : > { %v943_v53 = vpop.f32.mrf.mxu2  ;;  %v1216_v42 = vadd.f32 %v1215_v11, %v1033_v10 }
 0x180   : > { %v1112_v55 = vpop.f32.mrf.mxu3 }
 0x181   : > { %v865_v14 = vpop.f32.mrf.mxu0  ;;  %v2432_v18 = vadd.f32 %v1112_v55, %v943_v53 }
 0x182   : > { %v1034_v15 = vpop.f32.mrf.mxu1 }
 0x183   : > { %v1035_v17 = vadd.f32 %v1034_v15, %v865_v14  ;;  %1185 = vst [vmem:[%s2220_s9 + $0x1d0] sm:$0xff] %v2432_v18 }
 0x185   : > { %1154 = vst [vmem:[%s2220_s9 + $0xd8] sm:$0xff] %v1035_v17  ;;  %v1287_v14 = vmul.f32 %v1035_v17, %v1035_v17  ;;  %v1217_v54 = vadd.f32 %v1216_v42, %v1035_v17 }
 0x187   : > { %v945_v19 = vpop.f32.mrf.mxu2 }
 0x188   : > { %v1114_v48 = vpop.f32.mrf.mxu3 }
 0x189   : > { %v868_v20 = vpop.f32.mrf.mxu0 }
 0x18a   : > { %v1037_v21 = vpop.f32.mrf.mxu1 }
 0x18b   : > { %v1038_v24 = vadd.f32 %v1037_v21, %v868_v20  ;;  %v2434_v20 = vadd.f32 %v1114_v48, %v945_v19  ;;  %v1349_v21 = vadd.f32 %v1348_v25, %v1286_v23  ;;  %v1297_v48 = vmul.f32 %v2282_v35, %v2282_v35 }
 0x18d   : > { %1155 = vst [vmem:[%s2220_s9 + $0xe0] sm:$0xff] %v1038_v24  ;;  %v1288_v31 = vmul.f32 %v1038_v24, %v1038_v24  ;;  %v1350_v0 = vadd.f32 %v1349_v21, %v1287_v14  ;;  %v1218_v33 = vadd.f32 %v1217_v54, %v1038_v24  ;;  %v1292_v24 = vmul.f32 %v2242_v30, %v2242_v30 }
 0x18e   : > { %1186 = vst [vmem:[%s2220_s9 + $0x1d8] sm:$0xff] %v2434_v20 }
 0x18f   : > { %v1351_v10 = vadd.f32 %v1350_v0, %v1288_v31  ;;  %v948_v53 = vpop.f32.mrf.mxu2 }
 0x190   : > { %v1117_v17 = vpop.f32.mrf.mxu3 }
 0x191   : > { %v870_v47 = vpop.f32.mrf.mxu0  ;;  %v2451_v25 = vadd.f32 %v1117_v17, %v948_v53 }
 0x192   : > { %v1039_v49 = vpop.f32.mrf.mxu1 }
 0x193   : > { %v1040_v52 = vadd.f32 %v1039_v49, %v870_v47  ;;  %1187 = vst [vmem:[%s2220_s9 + $0x1e0] sm:$0xff] %v2451_v25 }
 0x195   : > { %1156 = vst [vmem:[%s2220_s9 + $0xe8] sm:$0xff] %v1040_v52  ;;  %v1289_v40 = vmul.f32 %v1040_v52, %v1040_v52  ;;  %v1219_v41 = vadd.f32 %v1218_v33, %v1040_v52 }
 0x197   : > { %v1352_v47 = vadd.f32 %v1351_v10, %v1289_v40  ;;  %v1299_v10 = vmul.f32 %v2300_v3, %v2300_v3 }
 0x199   : > { %v873_v32 = vpop.f32.mrf.mxu0 }
 0x19a   : > { %v1042_v12 = vpop.f32.mrf.mxu1 }
 0x19b   : > { %v1043_v15 = vadd.f32 %v1042_v12, %v873_v32  ;;  %v950_v32 = vpop.f32.mrf.mxu2  ;;  %v1119_v12 = vpop.f32.mrf.mxu3 }
 0x19c   : > { %v2453_v42 = vadd.f32 %v1119_v12, %v950_v32 }
 0x19d   : > { %1157 = vst [vmem:[%s2220_s9 + $0xf0] sm:$0xff] %v1043_v15  ;;  %v1290_v43 = vmul.f32 %v1043_v15, %v1043_v15  ;;  %v1220_v49 = vadd.f32 %v1219_v41, %v1043_v15 }
 0x19e   : > { %1188 = vst [vmem:[%s2220_s9 + $0x1e8] sm:$0xff] %v2453_v42 }
 0x19f   : > { %v1353_v55 = vadd.f32 %v1352_v47, %v1290_v43  ;;  %v1300_v43 = vmul.f32 %v2314_v27, %v2314_v27 }
 0x1a1   : > { %v875_v44 = vpop.f32.mrf.mxu0 }
 0x1a2   : > { %v1044_v46 = vpop.f32.mrf.mxu1 }
 0x1a3   : > { %v1045_v50 = vadd.f32 %v1044_v46, %v875_v44  ;;  %v953_v33 = vpop.f32.mrf.mxu2  ;;  %v1122_v40 = vpop.f32.mrf.mxu3 }
 0x1a4   : > { %v2483_v53 = vadd.f32 %v1122_v40, %v953_v33 }
 0x1a5   : > { %1158 = vst [vmem:[%s2220_s9 + $0xf8] sm:$0xff] %v1045_v50  ;;  %v1221_v57 = vadd.f32 %v1220_v49, %v1045_v50  ;;  %v1291_v61 = vmul.f32 %v1045_v50, %v1045_v50  ;;  %v1302_v49 = vmul.f32 %v2332_v62, %v2332_v62 }
 0x1a6   : > { %1189 = vst [vmem:[%s2220_s9 + $0x1f0] sm:$0xff] %v2483_v53 }
 0x1a7   : > { %v1222_v63 = vadd.f32 %v1221_v57, %v2242_v30  ;;  %v1354_v52 = vadd.f32 %v1353_v55, %v1291_v61  ;;  %v1295_v30 = vmul.f32 %v2264_v4, %v2264_v4 }
 0x1a9   : > { %v1223_v5 = vadd.f32 %v1222_v63, %v2246_v38  ;;  %v1355_v7 = vadd.f32 %v1354_v52, %v1292_v24  ;;  %v1296_v38 = vmul.f32 %v2278_v26, %v2278_v26  ;;  %v1305_v52 = vmul.f32 %v2350_v36, %v2350_v36 }
 0x1ab   : > { %v1224_v11 = vadd.f32 %v1223_v5, %v2260_v60  ;;  %v1356_v23 = vadd.f32 %v1355_v7, %v1293_v2  ;;  %v955_v17 = vpop.f32.mrf.mxu2  ;;  %v1124_v55 = vpop.f32.mrf.mxu3 }
 0x1ac   : > { %v2485_v57 = vadd.f32 %v1124_v55, %v955_v17  ;;  %v1321_v17 = vmul.f32 %v2453_v42, %v2453_v42 }
 0x1ad   : > { %v1225_v14 = vadd.f32 %v1224_v11, %v2264_v4  ;;  %v1357_v15 = vadd.f32 %v1356_v23, %v1294_v9  ;;  %v1298_v4 = vmul.f32 %v2296_v58, %v2296_v58  ;;  %v1307_v11 = vmul.f32 %v2364_v1, %v2364_v1 }
 0x1ae   : > { %1190 = vst [vmem:[%s2220_s9 + $0x1f8] sm:$0xff] %v2485_v57 }
 0x1af   : > { %v1226_v60 = vadd.f32 %v1225_v14, %v2278_v26  ;;  %v1358_v19 = vadd.f32 %v1357_v15, %v1295_v30 }
 0x1b1   : > { %v1227_v21 = vadd.f32 %v1226_v60, %v2282_v35  ;;  %v1359_v54 = vadd.f32 %v1358_v19, %v1296_v38 }
 0x1b3   : > { %v1228_v31 = vadd.f32 %v1227_v21, %v2296_v58  ;;  %v1360_v0 = vadd.f32 %v1359_v54, %v1297_v48  ;;  %v1301_v58 = vmul.f32 %v2318_v37, %v2318_v37 }
 0x1b5   : > { %v1229_v26 = vadd.f32 %v1228_v31, %v2300_v3  ;;  %v1361_v41 = vadd.f32 %v1360_v0, %v1298_v4 }
 0x1b7   : > { %v1230_v35 = vadd.f32 %v1229_v26, %v2314_v27  ;;  %v1362_v44 = vadd.f32 %v1361_v41, %v1299_v10  ;;  %v1303_v27 = vmul.f32 %v2336_v8, %v2336_v8  ;;  %v1316_v26 = vmul.f32 %v2417_v29, %v2417_v29 }
 0x1b9   : > { %v1231_v46 = vadd.f32 %v1230_v35, %v2318_v37  ;;  %v1363_v47 = vadd.f32 %v1362_v44, %v1300_v43  ;;  %v1304_v37 = vmul.f32 %v2346_v28, %v2346_v28  ;;  %v1317_v35 = vmul.f32 %v2419_v34, %v2419_v34 }
 0x1bb   : > { %v1232_v3 = vadd.f32 %v1231_v46, %v2332_v62  ;;  %v1364_v50 = vadd.f32 %v1363_v47, %v1301_v58  ;;  %v1318_v58 = vmul.f32 %v2432_v18, %v2432_v18  ;;  %v1319_v47 = vmul.f32 %v2434_v20, %v2434_v20 }
 0x1bd   : > { %v1233_v61 = vadd.f32 %v1232_v3, %v2336_v8  ;;  %v1365_v24 = vadd.f32 %v1364_v50, %v1302_v49  ;;  %v1306_v8 = vmul.f32 %v2360_v56, %v2360_v56  ;;  %v1320_v3 = vmul.f32 %v2451_v25, %v2451_v25 }
 0x1bf   : > { %v1366_v62 = vadd.f32 %v1365_v24, %v1303_v27  ;;  %v1234_v63 = vadd.f32 %v1233_v61, %v2346_v28  ;;  %v1308_v28 = vmul.f32 %v2370_v16, %v2370_v16  ;;  %v1322_v27 = vmul.f32 %v2483_v53, %v2483_v53 }
 0x1c0   : > { %v1323_v24 = vmul.f32 %v2485_v57, %v2485_v57 }
 0x1c1   : > { %v1235_v2 = vadd.f32 %v1234_v63, %v2350_v36  ;;  %v1367_v5 = vadd.f32 %v1366_v62, %v1304_v37  ;;  %v1309_v36 = vmul.f32 %v2374_v22, %v2374_v22 }
 0x1c3   : > { %v1236_v7 = vadd.f32 %v1235_v2, %v2360_v56  ;;  %v1368_v9 = vadd.f32 %v1367_v5, %v1305_v52  ;;  %v1310_v56 = vmul.f32 %v2387_v39, %v2387_v39 }
 0x1c5   : > { %v1237_v23 = vadd.f32 %v1236_v7, %v2364_v1  ;;  %v1369_v32 = vadd.f32 %v1368_v9, %v1306_v8  ;;  %v1311_v1 = vmul.f32 %v2391_v45, %v2391_v45 }
 0x1c7   : > { %v1238_v12 = vadd.f32 %v1237_v23, %v2370_v16  ;;  %v1370_v30 = vadd.f32 %v1369_v32, %v1307_v11  ;;  %v1312_v16 = vmul.f32 %v2397_v51, %v2397_v51 }
 0x1c9   : > { %v1239_v14 = vadd.f32 %v1238_v12, %v2374_v22  ;;  %v1371_v15 = vadd.f32 %v1370_v30, %v1308_v28  ;;  %v1313_v22 = vmul.f32 %v2401_v59, %v2401_v59 }
 0x1cb   : > { %v1240_v38 = vadd.f32 %v1239_v14, %v2387_v39  ;;  %v1372_v60 = vadd.f32 %v1371_v15, %v1309_v36  ;;  %v1314_v39 = vmul.f32 %v2407_v6, %v2407_v6 }
 0x1cd   : > { %v1241_v19 = vadd.f32 %v1240_v38, %v2391_v45  ;;  %v1373_v48 = vadd.f32 %v1372_v60, %v1310_v56  ;;  %v1315_v45 = vmul.f32 %v2411_v13, %v2411_v13 }
 0x1cf   : > { %v1242_v21 = vadd.f32 %v1241_v19, %v2397_v51  ;;  %v1374_v54 = vadd.f32 %v1373_v48, %v1311_v1 }
 0x1d1   : > { %v1243_v4 = vadd.f32 %v1242_v21, %v2401_v59  ;;  %v1375_v31 = vadd.f32 %v1374_v54, %v1312_v16 }
 0x1d3   : > { %v1244_v0 = vadd.f32 %v1243_v4, %v2407_v6  ;;  %v1376_v33 = vadd.f32 %v1375_v31, %v1313_v22 }
 0x1d5   : > { %v1245_v40 = vadd.f32 %v1244_v0, %v2411_v13  ;;  %v1377_v10 = vadd.f32 %v1376_v33, %v1314_v39 }
 0x1d7   : > { %v1246_v51 = vadd.f32 %v1245_v40, %v2417_v29  ;;  %v1378_v41 = vadd.f32 %v1377_v10, %v1315_v45 }
 0x1d9   : > { %v1379_v59 = vadd.f32 %v1378_v41, %v1316_v26  ;;  %v1247_v43 = vadd.f32 %v1246_v51, %v2419_v34 }
 0x1db   : > { %v1380_v6 = vadd.f32 %v1379_v59, %v1317_v35  ;;  %v1248_v44 = vadd.f32 %v1247_v43, %v2432_v18 }
 0x1dd   : > { %v1381_v13 = vadd.f32 %v1380_v6, %v1318_v58  ;;  %v1249_v46 = vadd.f32 %v1248_v44, %v2434_v20 }
 0x1df   : > { %v1382_v29 = vadd.f32 %v1381_v13, %v1319_v47  ;;  %v1250_v49 = vadd.f32 %v1249_v46, %v2451_v25 }
 0x1e1   : > { %v1383_v34 = vadd.f32 %v1382_v29, %v1320_v3  ;;  %v1251_v50 = vadd.f32 %v1250_v49, %v2453_v42 }
 0x1e3   : > { %v1384_v18 = vadd.f32 %v1383_v34, %v1321_v17  ;;  %v1252_v55 = vadd.f32 %v1251_v50, %v2483_v53 }
 0x1e5   : > { %v1385_v20 = vadd.f32 %v1384_v18, %v1322_v27  ;;  %v1253_v61 = vadd.f32 %v1252_v55, %v2485_v57 }
 0x1e7   : > { %v1254_v25 = vrot.slane %v1253_v61, 4  ;;  %v1386_v37 = vadd.f32 %v1385_v20, %v1323_v24 }
 0x1e9   : > { %v1255_v62 = vadd.f32 %v1254_v25, %v1253_v61  ;;  %v1387_v63 = vrot.slane %v1386_v37, 4 }
 0x1eb   : > { %v1256_v52 = vrot.slane %v1255_v62, 2  ;;  %v1388_v2 = vadd.f32 %v1387_v63, %v1386_v37 }
 0x1ed   : > { %v1257_v42 = vadd.f32 %v1256_v52, %v1255_v62  ;;  %v1389_v5 = vrot.slane %v1388_v2, 2 }
 0x1ef   : > { %v1258_v8 = vrot.slane %v1257_v42, 1  ;;  %v1390_v7 = vadd.f32 %v1389_v5, %v1388_v2 }
 0x1f1   : > { %v1259_v53 = vadd.f32 %v1258_v8, %v1257_v42  ;;  %v1391_v9 = vrot.slane %v1390_v7, 1 }
 0x1f3   : > { %v1392_v57 = vadd.f32 %v1391_v9, %v1390_v7  ;;  %1393 = vst [vmem:[%s269_s13] sm:$0xff] %v1259_v53 }
 0x1f5   : > { %1394 = vst [vmem:[%s276_s20] sm:$0xff] %v1392_v57 }
 0x1f6 PF: > { %s15_s17 = sadd.s32 1, %s2044_s17   ;;  %s2575_s15 = smov %s2040_s16 }
 0x1f7   : > { %p12_p5 = scmp.ge.s32.totalorder %s15_s17, 4   ;;  %s2576_s16 = smov %s2578_s18 }
 0x1f9   :  { %14 = sbr.rel (!%p12_p5) target bundleno = 2 (0x2), region = 82 }

// kernel: up_forward.5
= control target key start
LH: loop header
LB: loop body
LE: loop exit
PB: predicated region body
PF: predicated region fallthrough
CT: control target
= control target key end

     0   :  { %s954_s9 = smov 0   ;;  %s956_s10 = smov 0   ;;  %s1227_s0 = inlined_call_operand.vmem [shape: f32[2,512,128], index: 0, kind: input, shape index: {}]   ;;  %s1228_s1 = inlined_call_operand.vmem [shape: f32[2,8,128], index: 1, kind: input, shape index: {}]   ;;  %s1229_s2 = inlined_call_operand.vmem [shape: bf16[2,512,128], index: 2, kind: output, shape index: {}]  }
   0x1   :  { %s958_s11 = smov 0  }
   0x2 LB: > { %s24_s12 = sadd.s32 1, %s933_s10  ;;  %p690_p0 = scmp.ge.s32.totalorder %s937_s11, 1  ;;  %s937_s11 = sphi %s958_s11, %s12_s11   ;;  %s933_s10 = sphi %s956_s10, %s1231_s10   ;;  %s929_s9 = sphi %s954_s9, %s1230_s9  }
   0x3   : > { %p26_p1 = scmp.ge.s32.totalorder %s24_s12, 2  ;;  %p142_p2 = scmp.lt.s32.totalorder %s937_s11, 3 }
   0x5   : > { %s1233_s12 = smov (%p26_p1, %s24_s12), 0  ;;  %p143_p3 = pnand %p690_p0, %p142_p2 }
   0x6   : > { %p177_p4 = scmp.lt.s32.totalorder (!%p143_p3), %s929_s9, 1 }
   0x7   : > { %146 = sbr.rel (%p143_p3) target bundleno = 80 (0x50), region = 28 }
   0xc   : > { %s1235_s9 = smov (!%p177_p4, %s929_s9), 1 }
   0xd   : > { %s698_s13 = sshll.u32 %s1235_s9, 9  ;;  %s693_s14 = sshll.u32 %s1235_s9, 3 }
   0xe   : > { %s979_s17 = scalar_lea.vmem %s1227_s0, %s698_s13  ;;  %s189_s20 = scalar_lea.vmem %s1228_s1, %s693_s14 }
   0xf   : > { %v200_v0 = vld [vmem:[%s979_s17] sm:$0xff]  ;;  %v201_v1 = vld [vmem:[%s979_s17 + $0x8] sm:$0xff]  ;;  %v202_v5 = vld [vmem:[%s979_s17 + $0x10] sm:$0xff]  ;;  %s699_s21 = sshll.u32 %s1235_s9, 8 }
  0x10   : > { %v264_v2 = vld [vmem:[%s189_s20] sm:$0xff]  ;;  %v203_v6 = vld [vmem:[%s979_s17 + $0x18] sm:$0xff]  ;;  %v205_v8 = vld [vmem:[%s979_s17 + $0x28] sm:$0xff]  ;;  %s1020_s24 = scalar_lea.vmem %s1229_s2, %s699_s21 }
  0x11   : > { %v986_v3 = vperm.slane %v264_v2, 0  ;;  %v988_v4 = vperm.slane %v264_v2, 1  ;;  %v204_v7 = vld [vmem:[%s979_s17 + $0x20] sm:$0xff]  ;;  %v206_v9 = vld [vmem:[%s979_s17 + $0x30] sm:$0xff]  ;;  %v207_v10 = vld [vmem:[%s979_s17 + $0x38] sm:$0xff] }
  0x12   : > { %v208_v27 = vld [vmem:[%s979_s17 + $0x40] sm:$0xff]  ;;  %v209_v28 = vld [vmem:[%s979_s17 + $0x48] sm:$0xff]  ;;  %v210_v33 = vld [vmem:[%s979_s17 + $0x50] sm:$0xff] }
  0x13   : > { %v266_v11 = vsub.f32 %v200_v0, %v986_v3  ;;  %v267_v12 = vsub.f32 %v201_v1, %v986_v3  ;;  %v268_v13 = vsub.f32 %v202_v5, %v986_v3  ;;  %v269_v14 = vsub.f32 %v203_v6, %v986_v3  ;;  %v211_v34 = vld [vmem:[%s979_s17 + $0x58] sm:$0xff]  ;;  %v212_v39 = vld [vmem:[%s979_s17 + $0x60] sm:$0xff]  ;;  %v213_v40 = vld [vmem:[%s979_s17 + $0x68] sm:$0xff] }
  0x14   : > { %v270_v15 = vsub.f32 %v204_v7, %v986_v3  ;;  %v271_v16 = vsub.f32 %v205_v8, %v986_v3  ;;  %v272_v17 = vsub.f32 %v206_v9, %v986_v3  ;;  %v273_v18 = vsub.f32 %v207_v10, %v986_v3  ;;  %v214_v45 = vld [vmem:[%s979_s17 + $0x70] sm:$0xff]  ;;  %v215_v46 = vld [vmem:[%s979_s17 + $0x78] sm:$0xff]  ;;  %v216_v59 = vld [vmem:[%s979_s17 + $0x80] sm:$0xff] }
  0x15   : > { %v331_v19 = vmul.f32 %v988_v4, %v266_v11  ;;  %v332_v20 = vmul.f32 %v988_v4, %v267_v12  ;;  %v333_v21 = vmul.f32 %v988_v4, %v268_v13  ;;  %v334_v22 = vmul.f32 %v988_v4, %v269_v14  ;;  %v217_v0 = vld [vmem:[%s979_s17 + $0x88] sm:$0xff]  ;;  %v218_v7 = vld [vmem:[%s979_s17 + $0x90] sm:$0xff]  ;;  %v219_v8 = vld [vmem:[%s979_s17 + $0x98] sm:$0xff] }
  0x16   : > { %v335_v23 = vmul.f32 %v988_v4, %v270_v15  ;;  %v336_v24 = vmul.f32 %v988_v4, %v271_v16  ;;  %v337_v25 = vmul.f32 %v988_v4, %v272_v17  ;;  %v338_v26 = vmul.f32 %v988_v4, %v273_v18  ;;  %v220_v13 = vld [vmem:[%s979_s17 + $0xa0] sm:$0xff]  ;;  %v221_v14 = vld [vmem:[%s979_s17 + $0xa8] sm:$0xff] }
  0x17   : > { %v395_v29 = vmax.f32 %v331_v19, 0.0  ;;  %v396_v30 = vmax.f32 %v332_v20, 0.0  ;;  %v397_v31 = vmax.f32 %v333_v21, 0.0  ;;  %v398_v32 = vmax.f32 %v334_v22, 0.0  ;;  %v222_v19 = vld [vmem:[%s979_s17 + $0xb0] sm:$0xff] }
  0x18   : > { %v399_v35 = vmax.f32 %v335_v23, 0.0  ;;  %v400_v36 = vmax.f32 %v336_v24, 0.0  ;;  %v401_v37 = vmax.f32 %v337_v25, 0.0  ;;  %v402_v38 = vmax.f32 %v338_v26, 0.0  ;;  %v223_v24 = vld [vmem:[%s979_s17 + $0xb8] sm:$0xff] }
  0x19   : > { %v703_v41 = vpack.c.bf16 %v396_v30, %v395_v29  ;;  %v708_v42 = vpack.c.bf16 %v398_v32, %v397_v31  ;;  %v274_v43 = vsub.f32 %v208_v27, %v986_v3  ;;  %v275_v44 = vsub.f32 %v209_v28, %v986_v3  ;;  %v224_v29 = vld [vmem:[%s979_s17 + $0xc0] sm:$0xff] }
  0x1a   : > { %v713_v47 = vpack.c.bf16 %v400_v36, %v399_v35  ;;  %v718_v48 = vpack.c.bf16 %v402_v38, %v401_v37  ;;  %v276_v49 = vsub.f32 %v210_v33, %v986_v3  ;;  %v277_v50 = vsub.f32 %v211_v34, %v986_v3  ;;  %v225_v38 = vld [vmem:[%s979_s17 + $0xc8] sm:$0xff] }
  0x1b   : > { %704 = vst [vmem:[%s1020_s24] sm:$0xff] %v703_v41   ;;  %v339_v51 = vmul.f32 %v988_v4, %v274_v43  ;;  %v340_v52 = vmul.f32 %v988_v4, %v275_v44  ;;  %v278_v53 = vsub.f32 %v212_v39, %v986_v3  ;;  %v279_v54 = vsub.f32 %v213_v40, %v986_v3  ;;  %v226_v43 = vld [vmem:[%s979_s17 + $0xd0] sm:$0xff]  ;;  %v227_v44 = vld [vmem:[%s979_s17 + $0xd8] sm:$0xff] }
  0x1c   : > { %860 = vst [vmem:[%s1020_s24 + $0x8] sm:$0xff] %v708_v42   ;;  %v341_v55 = vmul.f32 %v988_v4, %v276_v49  ;;  %v342_v56 = vmul.f32 %v988_v4, %v277_v50  ;;  %v280_v57 = vsub.f32 %v214_v45, %v986_v3  ;;  %v281_v58 = vsub.f32 %v215_v46, %v986_v3  ;;  %v228_v49 = vld [vmem:[%s979_s17 + $0xe0] sm:$0xff]  ;;  %v229_v50 = vld [vmem:[%s979_s17 + $0xe8] sm:$0xff] }
  0x1d   : > { %861 = vst [vmem:[%s1020_s24 + $0x10] sm:$0xff] %v713_v47   ;;  %v403_v60 = vmax.f32 %v339_v51, 0.0  ;;  %v404_v61 = vmax.f32 %v340_v52, 0.0  ;;  %v343_v62 = vmul.f32 %v988_v4, %v278_v53  ;;  %v344_v63 = vmul.f32 %v988_v4, %v279_v54 }
  0x1e   : > { %862 = vst [vmem:[%s1020_s24 + $0x18] sm:$0xff] %v718_v48   ;;  %v405_v1 = vmax.f32 %v341_v55, 0.0  ;;  %v406_v2 = vmax.f32 %v342_v56, 0.0  ;;  %v345_v5 = vmul.f32 %v988_v4, %v280_v57  ;;  %v346_v6 = vmul.f32 %v988_v4, %v281_v58  ;;  %v230_v55 = vld [vmem:[%s979_s17 + $0xf0] sm:$0xff] }
  0x1f   : > { %v723_v9 = vpack.c.bf16 %v404_v61, %v403_v60  ;;  %v407_v10 = vmax.f32 %v343_v62, 0.0  ;;  %v408_v11 = vmax.f32 %v344_v63, 0.0  ;;  %v282_v12 = vsub.f32 %v216_v59, %v986_v3  ;;  %v231_v60 = vld [vmem:[%s979_s17 + $0xf8] sm:$0xff] }
  0x20   : > { %v728_v15 = vpack.c.bf16 %v406_v2, %v405_v1  ;;  %v409_v16 = vmax.f32 %v345_v5, 0.0  ;;  %v410_v17 = vmax.f32 %v346_v6, 0.0  ;;  %v283_v18 = vsub.f32 %v217_v0, %v986_v3  ;;  %v232_v1 = vld [vmem:[%s979_s17 + $0x100] sm:$0xff] }
  0x21   : > { %863 = vst [vmem:[%s1020_s24 + $0x20] sm:$0xff] %v723_v9   ;;  %v733_v20 = vpack.c.bf16 %v408_v11, %v407_v10  ;;  %v347_v21 = vmul.f32 %v988_v4, %v282_v12  ;;  %v284_v22 = vsub.f32 %v218_v7, %v986_v3  ;;  %v285_v23 = vsub.f32 %v219_v8, %v986_v3  ;;  %v233_v12 = vld [vmem:[%s979_s17 + $0x108] sm:$0xff] }
  0x22   : > { %864 = vst [vmem:[%s1020_s24 + $0x28] sm:$0xff] %v728_v15   ;;  %v738_v25 = vpack.c.bf16 %v410_v17, %v409_v16  ;;  %v348_v26 = vmul.f32 %v988_v4, %v283_v18  ;;  %v286_v27 = vsub.f32 %v220_v13, %v986_v3  ;;  %v287_v28 = vsub.f32 %v221_v14, %v986_v3  ;;  %v234_v17 = vld [vmem:[%s979_s17 + $0x110] sm:$0xff]  ;;  %v235_v18 = vld [vmem:[%s979_s17 + $0x118] sm:$0xff] }
  0x23   : > { %865 = vst [vmem:[%s1020_s24 + $0x30] sm:$0xff] %v733_v20   ;;  %v411_v30 = vmax.f32 %v347_v21, 0.0  ;;  %v349_v31 = vmul.f32 %v988_v4, %v284_v22  ;;  %v350_v32 = vmul.f32 %v988_v4, %v285_v23  ;;  %v288_v33 = vsub.f32 %v222_v19, %v986_v3  ;;  %v236_v23 = vld [vmem:[%s979_s17 + $0x120] sm:$0xff] }
  0x24   : > { %866 = vst [vmem:[%s1020_s24 + $0x38] sm:$0xff] %v738_v25   ;;  %v412_v34 = vmax.f32 %v348_v26, 0.0  ;;  %v351_v35 = vmul.f32 %v988_v4, %v286_v27  ;;  %v352_v36 = vmul.f32 %v988_v4, %v287_v28  ;;  %v289_v37 = vsub.f32 %v223_v24, %v986_v3  ;;  %v237_v24 = vld [vmem:[%s979_s17 + $0x128] sm:$0xff] }
  0x25   : > { %v413_v39 = vmax.f32 %v349_v31, 0.0  ;;  %v414_v40 = vmax.f32 %v350_v32, 0.0  ;;  %v353_v41 = vmul.f32 %v988_v4, %v288_v33  ;;  %v290_v42 = vsub.f32 %v224_v29, %v986_v3  ;;  %v238_v29 = vld [vmem:[%s979_s17 + $0x130] sm:$0xff] }
  0x26   : > { %v743_v45 = vpack.c.bf16 %v412_v34, %v411_v30  ;;  %v415_v46 = vmax.f32 %v351_v35, 0.0  ;;  %v416_v47 = vmax.f32 %v352_v36, 0.0  ;;  %v354_v48 = vmul.f32 %v988_v4, %v289_v37  ;;  %v239_v34 = vld [vmem:[%s979_s17 + $0x138] sm:$0xff] }
  0x27   : > { %v748_v51 = vpack.c.bf16 %v414_v40, %v413_v39  ;;  %v417_v52 = vmax.f32 %v353_v41, 0.0  ;;  %v291_v53 = vsub.f32 %v225_v38, %v986_v3  ;;  %v355_v54 = vmul.f32 %v988_v4, %v290_v42  ;;  %v240_v39 = vld [vmem:[%s979_s17 + $0x140] sm:$0xff] }
  0x28   : > { %867 = vst [vmem:[%s1020_s24 + $0x40] sm:$0xff] %v743_v45   ;;  %v753_v56 = vpack.c.bf16 %v416_v47, %v415_v46  ;;  %v418_v57 = vmax.f32 %v354_v48, 0.0  ;;  %v292_v58 = vsub.f32 %v226_v43, %v986_v3  ;;  %v293_v59 = vsub.f32 %v227_v44, %v986_v3  ;;  %v241_v48 = vld [vmem:[%s979_s17 + $0x148] sm:$0xff] }
  0x29   : > { %868 = vst [vmem:[%s1020_s24 + $0x48] sm:$0xff] %v748_v51   ;;  %v356_v61 = vmul.f32 %v988_v4, %v291_v53  ;;  %v419_v62 = vmax.f32 %v355_v54, 0.0  ;;  %v294_v63 = vsub.f32 %v228_v49, %v986_v3  ;;  %v295_v0 = vsub.f32 %v229_v50, %v986_v3  ;;  %v242_v53 = vld [vmem:[%s979_s17 + $0x150] sm:$0xff]  ;;  %v243_v54 = vld [vmem:[%s979_s17 + $0x158] sm:$0xff] }
  0x2a   : > { %869 = vst [vmem:[%s1020_s24 + $0x50] sm:$0xff] %v753_v56   ;;  %v758_v2 = vpack.c.bf16 %v418_v57, %v417_v52  ;;  %v357_v5 = vmul.f32 %v988_v4, %v292_v58  ;;  %v358_v6 = vmul.f32 %v988_v4, %v293_v59  ;;  %v296_v7 = vsub.f32 %v230_v55, %v986_v3  ;;  %v244_v59 = vld [vmem:[%s979_s17 + $0x160] sm:$0xff] }
  0x2b   : > { %v420_v8 = vmax.f32 %v356_v61, 0.0  ;;  %v359_v9 = vmul.f32 %v988_v4, %v294_v63  ;;  %v360_v10 = vmul.f32 %v988_v4, %v295_v0  ;;  %v297_v11 = vsub.f32 %v231_v60, %v986_v3  ;;  %v245_v60 = vld [vmem:[%s979_s17 + $0x168] sm:$0xff] }
  0x2c   : > { %870 = vst [vmem:[%s1020_s24 + $0x58] sm:$0xff] %v758_v2   ;;  %v421_v13 = vmax.f32 %v357_v5, 0.0  ;;  %v422_v14 = vmax.f32 %v358_v6, 0.0  ;;  %v361_v15 = vmul.f32 %v988_v4, %v296_v7  ;;  %v298_v16 = vsub.f32 %v232_v1, %v986_v3  ;;  %v246_v1 = vld [vmem:[%s979_s17 + $0x170] sm:$0xff] }
  0x2d   : > { %v763_v19 = vpack.c.bf16 %v420_v8, %v419_v62  ;;  %v423_v20 = vmax.f32 %v359_v9, 0.0  ;;  %v424_v21 = vmax.f32 %v360_v10, 0.0  ;;  %v362_v22 = vmul.f32 %v988_v4, %v297_v11  ;;  %v247_v8 = vld [vmem:[%s979_s17 + $0x178] sm:$0xff] }
  0x2e   : > { %v768_v25 = vpack.c.bf16 %v422_v14, %v421_v13  ;;  %v425_v26 = vmax.f32 %v361_v15, 0.0  ;;  %v299_v27 = vsub.f32 %v233_v12, %v986_v3  ;;  %v363_v28 = vmul.f32 %v988_v4, %v298_v16  ;;  %v248_v13 = vld [vmem:[%s979_s17 + $0x180] sm:$0xff] }
  0x2f   : > { %871 = vst [vmem:[%s1020_s24 + $0x60] sm:$0xff] %v763_v19   ;;  %v773_v30 = vpack.c.bf16 %v424_v21, %v423_v20  ;;  %v426_v31 = vmax.f32 %v362_v22, 0.0  ;;  %v300_v32 = vsub.f32 %v234_v17, %v986_v3  ;;  %v301_v33 = vsub.f32 %v235_v18, %v986_v3  ;;  %v249_v22 = vld [vmem:[%s979_s17 + $0x188] sm:$0xff] }
  0x30   : > { %872 = vst [vmem:[%s1020_s24 + $0x68] sm:$0xff] %v768_v25   ;;  %v364_v35 = vmul.f32 %v988_v4, %v299_v27  ;;  %v427_v36 = vmax.f32 %v363_v28, 0.0  ;;  %v302_v37 = vsub.f32 %v236_v23, %v986_v3  ;;  %v303_v38 = vsub.f32 %v237_v24, %v986_v3  ;;  %v250_v27 = vld [vmem:[%s979_s17 + $0x190] sm:$0xff]  ;;  %v251_v28 = vld [vmem:[%s979_s17 + $0x198] sm:$0xff] }
  0x31   : > { %873 = vst [vmem:[%s1020_s24 + $0x70] sm:$0xff] %v773_v30   ;;  %v778_v40 = vpack.c.bf16 %v426_v31, %v425_v26  ;;  %v365_v41 = vmul.f32 %v988_v4, %v300_v32  ;;  %v366_v42 = vmul.f32 %v988_v4, %v301_v33  ;;  %v304_v43 = vsub.f32 %v238_v29, %v986_v3  ;;  %v252_v33 = vld [vmem:[%s979_s17 + $0x1a0] sm:$0xff] }
  0x32   : > { %v428_v44 = vmax.f32 %v364_v35, 0.0  ;;  %v367_v45 = vmul.f32 %v988_v4, %v302_v37  ;;  %v368_v46 = vmul.f32 %v988_v4, %v303_v38  ;;  %v305_v47 = vsub.f32 %v239_v34, %v986_v3  ;;  %v253_v34 = vld [vmem:[%s979_s17 + $0x1a8] sm:$0xff] }
  0x33   : > { %874 = vst [vmem:[%s1020_s24 + $0x78] sm:$0xff] %v778_v40   ;;  %v429_v49 = vmax.f32 %v365_v41, 0.0  ;;  %v430_v50 = vmax.f32 %v366_v42, 0.0  ;;  %v369_v51 = vmul.f32 %v988_v4, %v304_v43  ;;  %v306_v52 = vsub.f32 %v240_v39, %v986_v3  ;;  %v254_v39 = vld [vmem:[%s979_s17 + $0x1b0] sm:$0xff] }
  0x34   : > { %v783_v55 = vpack.c.bf16 %v428_v44, %v427_v36  ;;  %v431_v56 = vmax.f32 %v367_v45, 0.0  ;;  %v432_v57 = vmax.f32 %v368_v46, 0.0  ;;  %v370_v58 = vmul.f32 %v988_v4, %v305_v47  ;;  %v255_v44 = vld [vmem:[%s979_s17 + $0x1b8] sm:$0xff] }
  0x35   : > { %v788_v61 = vpack.c.bf16 %v430_v50, %v429_v49  ;;  %v433_v62 = vmax.f32 %v369_v51, 0.0  ;;  %v307_v63 = vsub.f32 %v241_v48, %v986_v3  ;;  %v371_v0 = vmul.f32 %v988_v4, %v306_v52  ;;  %v256_v49 = vld [vmem:[%s979_s17 + $0x1c0] sm:$0xff] }
  0x36   : > { %875 = vst [vmem:[%s1020_s24 + $0x80] sm:$0xff] %v783_v55   ;;  %v793_v2 = vpack.c.bf16 %v432_v57, %v431_v56  ;;  %v434_v5 = vmax.f32 %v370_v58, 0.0  ;;  %v308_v6 = vsub.f32 %v242_v53, %v986_v3  ;;  %v309_v7 = vsub.f32 %v243_v54, %v986_v3  ;;  %v257_v58 = vld [vmem:[%s979_s17 + $0x1c8] sm:$0xff] }
  0x37   : > { %876 = vst [vmem:[%s1020_s24 + $0x88] sm:$0xff] %v788_v61   ;;  %v372_v9 = vmul.f32 %v988_v4, %v307_v63  ;;  %v435_v10 = vmax.f32 %v371_v0, 0.0  ;;  %v310_v11 = vsub.f32 %v244_v59, %v986_v3  ;;  %v311_v12 = vsub.f32 %v245_v60, %v986_v3  ;;  %v258_v63 = vld [vmem:[%s979_s17 + $0x1d0] sm:$0xff]  ;;  %v259_v0 = vld [vmem:[%s979_s17 + $0x1d8] sm:$0xff] }
  0x38   : > { %877 = vst [vmem:[%s1020_s24 + $0x90] sm:$0xff] %v793_v2   ;;  %v798_v14 = vpack.c.bf16 %v434_v5, %v433_v62  ;;  %v373_v15 = vmul.f32 %v988_v4, %v308_v6  ;;  %v374_v16 = vmul.f32 %v988_v4, %v309_v7  ;;  %v312_v17 = vsub.f32 %v246_v1, %v986_v3  ;;  %v260_v7 = vld [vmem:[%s979_s17 + $0x1e0] sm:$0xff] }
  0x39   : > { %v436_v18 = vmax.f32 %v372_v9, 0.0  ;;  %v375_v19 = vmul.f32 %v988_v4, %v310_v11  ;;  %v376_v20 = vmul.f32 %v988_v4, %v311_v12  ;;  %v313_v21 = vsub.f32 %v247_v8, %v986_v3  ;;  %v261_v8 = vld [vmem:[%s979_s17 + $0x1e8] sm:$0xff] }
  0x3a   : > { %878 = vst [vmem:[%s1020_s24 + $0x98] sm:$0xff] %v798_v14   ;;  %v437_v23 = vmax.f32 %v373_v15, 0.0  ;;  %v438_v24 = vmax.f32 %v374_v16, 0.0  ;;  %v377_v25 = vmul.f32 %v988_v4, %v312_v17  ;;  %v314_v26 = vsub.f32 %v248_v13, %v986_v3  ;;  %v262_v13 = vld [vmem:[%s979_s17 + $0x1f0] sm:$0xff] }
  0x3b   : > { %v803_v29 = vpack.c.bf16 %v436_v18, %v435_v10  ;;  %v439_v30 = vmax.f32 %v375_v19, 0.0  ;;  %v440_v31 = vmax.f32 %v376_v20, 0.0  ;;  %v378_v32 = vmul.f32 %v988_v4, %v313_v21  ;;  %v263_v18 = vld [vmem:[%s979_s17 + $0x1f8] sm:$0xff] }
  0x3c   : > { %v808_v35 = vpack.c.bf16 %v438_v24, %v437_v23  ;;  %v441_v36 = vmax.f32 %v377_v25, 0.0  ;;  %v315_v37 = vsub.f32 %v249_v22, %v986_v3  ;;  %v379_v38 = vmul.f32 %v988_v4, %v314_v26 }
  0x3d   : > { %879 = vst [vmem:[%s1020_s24 + $0xa0] sm:$0xff] %v803_v29   ;;  %v813_v40 = vpack.c.bf16 %v440_v31, %v439_v30  ;;  %v442_v41 = vmax.f32 %v378_v32, 0.0  ;;  %v316_v42 = vsub.f32 %v250_v27, %v986_v3  ;;  %v317_v43 = vsub.f32 %v251_v28, %v986_v3 }
  0x3e   : > { %880 = vst [vmem:[%s1020_s24 + $0xa8] sm:$0xff] %v808_v35   ;;  %v380_v45 = vmul.f32 %v988_v4, %v315_v37  ;;  %v443_v46 = vmax.f32 %v379_v38, 0.0  ;;  %v318_v47 = vsub.f32 %v252_v33, %v986_v3  ;;  %v319_v48 = vsub.f32 %v253_v34, %v986_v3 }
  0x3f   : > { %881 = vst [vmem:[%s1020_s24 + $0xb0] sm:$0xff] %v813_v40   ;;  %v818_v50 = vpack.c.bf16 %v442_v41, %v441_v36  ;;  %v381_v51 = vmul.f32 %v988_v4, %v316_v42  ;;  %v382_v52 = vmul.f32 %v988_v4, %v317_v43  ;;  %v320_v53 = vsub.f32 %v254_v39, %v986_v3 }
  0x40   : > { %v444_v54 = vmax.f32 %v380_v45, 0.0  ;;  %v383_v55 = vmul.f32 %v988_v4, %v318_v47  ;;  %v384_v56 = vmul.f32 %v988_v4, %v319_v48  ;;  %v321_v57 = vsub.f32 %v255_v44, %v986_v3 }
  0x41   : > { %882 = vst [vmem:[%s1020_s24 + $0xb8] sm:$0xff] %v818_v50   ;;  %v445_v59 = vmax.f32 %v381_v51, 0.0  ;;  %v446_v60 = vmax.f32 %v382_v52, 0.0  ;;  %v385_v61 = vmul.f32 %v988_v4, %v320_v53  ;;  %v322_v62 = vsub.f32 %v256_v49, %v986_v3 }
  0x42   : > { %v823_v1 = vpack.c.bf16 %v444_v54, %v443_v46  ;;  %v447_v2 = vmax.f32 %v383_v55, 0.0  ;;  %v448_v5 = vmax.f32 %v384_v56, 0.0  ;;  %v386_v6 = vmul.f32 %v988_v4, %v321_v57 }
  0x43   : > { %v828_v9 = vpack.c.bf16 %v446_v60, %v445_v59  ;;  %v449_v10 = vmax.f32 %v385_v61, 0.0  ;;  %v323_v11 = vsub.f32 %v257_v58, %v986_v3  ;;  %v387_v12 = vmul.f32 %v988_v4, %v322_v62 }
  0x44   : > { %883 = vst [vmem:[%s1020_s24 + $0xc0] sm:$0xff] %v823_v1   ;;  %v833_v14 = vpack.c.bf16 %v448_v5, %v447_v2  ;;  %v450_v15 = vmax.f32 %v386_v6, 0.0  ;;  %v324_v16 = vsub.f32 %v258_v63, %v986_v3  ;;  %v325_v17 = vsub.f32 %v259_v0, %v986_v3 }
  0x45   : > { %884 = vst [vmem:[%s1020_s24 + $0xc8] sm:$0xff] %v828_v9   ;;  %v388_v19 = vmul.f32 %v988_v4, %v323_v11  ;;  %v451_v20 = vmax.f32 %v387_v12, 0.0  ;;  %v326_v21 = vsub.f32 %v260_v7, %v986_v3  ;;  %v327_v22 = vsub.f32 %v261_v8, %v986_v3 }
  0x46   : > { %885 = vst [vmem:[%s1020_s24 + $0xd0] sm:$0xff] %v833_v14   ;;  %v838_v23 = vpack.c.bf16 %v450_v15, %v449_v10  ;;  %v389_v24 = vmul.f32 %v988_v4, %v324_v16  ;;  %v390_v25 = vmul.f32 %v988_v4, %v325_v17  ;;  %v328_v26 = vsub.f32 %v262_v13, %v986_v3 }
  0x47   : > { %v452_v27 = vmax.f32 %v388_v19, 0.0  ;;  %v391_v28 = vmul.f32 %v988_v4, %v326_v21  ;;  %v392_v29 = vmul.f32 %v988_v4, %v327_v22  ;;  %v329_v30 = vsub.f32 %v263_v18, %v986_v3 }
  0x48   : > { %886 = vst [vmem:[%s1020_s24 + $0xd8] sm:$0xff] %v838_v23   ;;  %v453_v31 = vmax.f32 %v389_v24, 0.0  ;;  %v454_v32 = vmax.f32 %v390_v25, 0.0  ;;  %v393_v33 = vmul.f32 %v988_v4, %v328_v26 }
  0x49   : > { %v843_v34 = vpack.c.bf16 %v452_v27, %v451_v20  ;;  %v455_v35 = vmax.f32 %v391_v28, 0.0  ;;  %v456_v36 = vmax.f32 %v392_v29, 0.0  ;;  %v394_v37 = vmul.f32 %v988_v4, %v329_v30 }
  0x4a   : > { %v848_v38 = vpack.c.bf16 %v454_v32, %v453_v31  ;;  %v457_v39 = vmax.f32 %v393_v33, 0.0 }
  0x4b   : > { %887 = vst [vmem:[%s1020_s24 + $0xe0] sm:$0xff] %v843_v34   ;;  %v853_v40 = vpack.c.bf16 %v456_v36, %v455_v35  ;;  %v458_v41 = vmax.f32 %v394_v37, 0.0 }
  0x4c   : > { %888 = vst [vmem:[%s1020_s24 + $0xe8] sm:$0xff] %v848_v38  }
  0x4d   : > { %889 = vst [vmem:[%s1020_s24 + $0xf0] sm:$0xff] %v853_v40   ;;  %v858_v42 = vpack.c.bf16 %v458_v41, %v457_v39 }
  0x4f   : > { %890 = vst [vmem:[%s1020_s24 + $0xf8] sm:$0xff] %v858_v42  }
  0x50 PF: > { %s12_s11 = sadd.s32 1, %s937_s11   ;;  %s1230_s9 = smov %s933_s10 }
  0x51   : > { %p9_p5 = scmp.ge.s32.totalorder %s12_s11, 4   ;;  %s1231_s10 = smov %s1233_s12 }
  0x53   :  { %11 = sbr.rel (!%p9_p5) target bundleno = 2 (0x2), region = 61 }

// kernel: up_forward.7
= control target key start
LH: loop header
LB: loop body
LE: loop exit
PB: predicated region body
PF: predicated region fallthrough
CT: control target
= control target key end

     0   :  { %s699_s9 = smov 0   ;;  %s701_s10 = smov 0   ;;  %s1006_s0 = inlined_call_operand.vmem [shape: f32[2,512,128], index: 0, kind: input, shape index: {}]   ;;  %s1007_s1 = inlined_call_operand.vmem [shape: f32[2,8,128], index: 1, kind: input, shape index: {}]   ;;  %s1008_s2 = inlined_call_operand.vmem [shape: f32[2,512,128], index: 2, kind: output, shape index: {}]  }
   0x1   :  { %s703_s11 = smov 0  }
   0x2 LB: > { %s24_s12 = sadd.s32 1, %s678_s10  ;;  %p626_p0 = scmp.ge.s32.totalorder %s682_s11, 1  ;;  %s682_s11 = sphi %s703_s11, %s12_s11   ;;  %s678_s10 = sphi %s701_s10, %s1010_s10   ;;  %s674_s9 = sphi %s699_s9, %s1009_s9  }
   0x3   : > { %p26_p1 = scmp.ge.s32.totalorder %s24_s12, 2  ;;  %p142_p2 = scmp.lt.s32.totalorder %s682_s11, 3 }
   0x5   : > { %s1012_s12 = smov (%p26_p1, %s24_s12), 0  ;;  %p143_p3 = pnand %p626_p0, %p142_p2 }
   0x6   : > { %p177_p4 = scmp.lt.s32.totalorder (!%p143_p3), %s674_s9, 1 }
   0x7   : > { %146 = sbr.rel (%p143_p3) target bundleno = 89 (0x59), region = 28 }
   0xc   : > { %s1014_s9 = smov (!%p177_p4, %s674_s9), 1 }
   0xd   : > { %s634_s13 = sshll.u32 %s1014_s9, 9  ;;  %s629_s14 = sshll.u32 %s1014_s9, 3 }
   0xe   : > { %s724_s17 = scalar_lea.vmem %s1006_s0, %s634_s13  ;;  %s189_s20 = scalar_lea.vmem %s1007_s1, %s629_s14 }
   0xf   : > { %v200_v0 = vld [vmem:[%s724_s17] sm:$0xff]  ;;  %v201_v2 = vld [vmem:[%s724_s17 + $0x8] sm:$0xff]  ;;  %v202_v5 = vld [vmem:[%s724_s17 + $0x10] sm:$0xff]  ;;  %s757_s23 = scalar_lea.vmem %s1008_s2, %s634_s13 }
  0x10   : > { %v264_v1 = vld [vmem:[%s189_s20] sm:$0xff]  ;;  %v203_v6 = vld [vmem:[%s724_s17 + $0x18] sm:$0xff]  ;;  %v205_v8 = vld [vmem:[%s724_s17 + $0x28] sm:$0xff] }
  0x11   : > { %v731_v3 = vperm.slane %v264_v1, 0  ;;  %v733_v4 = vperm.slane %v264_v1, 1  ;;  %v204_v7 = vld [vmem:[%s724_s17 + $0x20] sm:$0xff]  ;;  %v206_v9 = vld [vmem:[%s724_s17 + $0x30] sm:$0xff]  ;;  %v207_v10 = vld [vmem:[%s724_s17 + $0x38] sm:$0xff] }
  0x12   : > { %v208_v23 = vld [vmem:[%s724_s17 + $0x40] sm:$0xff]  ;;  %v209_v26 = vld [vmem:[%s724_s17 + $0x48] sm:$0xff]  ;;  %v210_v27 = vld [vmem:[%s724_s17 + $0x50] sm:$0xff] }
  0x13   : > { %v266_v11 = vsub.f32 %v200_v0, %v731_v3  ;;  %v267_v12 = vsub.f32 %v201_v2, %v731_v3  ;;  %v268_v13 = vsub.f32 %v202_v5, %v731_v3  ;;  %v269_v14 = vsub.f32 %v203_v6, %v731_v3  ;;  %v211_v28 = vld [vmem:[%s724_s17 + $0x58] sm:$0xff]  ;;  %v212_v33 = vld [vmem:[%s724_s17 + $0x60] sm:$0xff]  ;;  %v213_v34 = vld [vmem:[%s724_s17 + $0x68] sm:$0xff] }
  0x14   : > { %v270_v15 = vsub.f32 %v204_v7, %v731_v3  ;;  %v271_v16 = vsub.f32 %v205_v8, %v731_v3  ;;  %v272_v17 = vsub.f32 %v206_v9, %v731_v3  ;;  %v273_v18 = vsub.f32 %v207_v10, %v731_v3  ;;  %v214_v35 = vld [vmem:[%s724_s17 + $0x70] sm:$0xff]  ;;  %v215_v43 = vld [vmem:[%s724_s17 + $0x78] sm:$0xff]  ;;  %v216_v55 = vld [vmem:[%s724_s17 + $0x80] sm:$0xff] }
  0x15   : > { %v331_v19 = vmul.f32 %v733_v4, %v266_v11  ;;  %v332_v20 = vmul.f32 %v733_v4, %v267_v12  ;;  %v333_v21 = vmul.f32 %v733_v4, %v268_v13  ;;  %v334_v22 = vmul.f32 %v733_v4, %v269_v14  ;;  %v217_v56 = vld [vmem:[%s724_s17 + $0x88] sm:$0xff]  ;;  %v218_v57 = vld [vmem:[%s724_s17 + $0x90] sm:$0xff]  ;;  %v219_v60 = vld [vmem:[%s724_s17 + $0x98] sm:$0xff] }
  0x16   : > { %v335_v24 = vmul.f32 %v733_v4, %v270_v15  ;;  %v336_v25 = vmul.f32 %v733_v4, %v271_v16  ;;  %v337_v32 = vmul.f32 %v733_v4, %v272_v17  ;;  %v338_v38 = vmul.f32 %v733_v4, %v273_v18  ;;  %v220_v0 = vld [vmem:[%s724_s17 + $0xa0] sm:$0xff]  ;;  %v221_v7 = vld [vmem:[%s724_s17 + $0xa8] sm:$0xff]  ;;  %v222_v11 = vld [vmem:[%s724_s17 + $0xb0] sm:$0xff] }
  0x17   : > { %v395_v29 = vmax.f32 %v331_v19, 0.0  ;;  %v396_v30 = vmax.f32 %v332_v20, 0.0  ;;  %v397_v31 = vmax.f32 %v333_v21, 0.0  ;;  %v398_v36 = vmax.f32 %v334_v22, 0.0  ;;  %v223_v15 = vld [vmem:[%s724_s17 + $0xb8] sm:$0xff]  ;;  %v224_v19 = vld [vmem:[%s724_s17 + $0xc0] sm:$0xff] }
  0x18   : > { %v399_v37 = vmax.f32 %v335_v24, 0.0  ;;  %v274_v39 = vsub.f32 %v208_v23, %v731_v3  ;;  %v275_v40 = vsub.f32 %v209_v26, %v731_v3  ;;  %v276_v41 = vsub.f32 %v210_v27, %v731_v3  ;;  %v225_v23 = vld [vmem:[%s724_s17 + $0xc8] sm:$0xff]  ;;  %v226_v27 = vld [vmem:[%s724_s17 + $0xd0] sm:$0xff] }
  0x19   : > { %459 = vst [vmem:[%s757_s23] sm:$0xff] %v395_v29  ;;  %v277_v42 = vsub.f32 %v211_v28, %v731_v3  ;;  %v400_v44 = vmax.f32 %v336_v25, 0.0  ;;  %v278_v45 = vsub.f32 %v212_v33, %v731_v3  ;;  %v279_v46 = vsub.f32 %v213_v34, %v731_v3 }
  0x1a   : > { %460 = vst [vmem:[%s757_s23 + $0x8] sm:$0xff] %v396_v30  ;;  %v280_v47 = vsub.f32 %v214_v35, %v731_v3  ;;  %v401_v48 = vmax.f32 %v337_v32, 0.0  ;;  %v339_v49 = vmul.f32 %v733_v4, %v274_v39  ;;  %v340_v50 = vmul.f32 %v733_v4, %v275_v40  ;;  %v228_v35 = vld [vmem:[%s724_s17 + $0xe0] sm:$0xff]  ;;  %v229_v39 = vld [vmem:[%s724_s17 + $0xe8] sm:$0xff] }
  0x1b   : > { %461 = vst [vmem:[%s757_s23 + $0x10] sm:$0xff] %v397_v31  ;;  %v341_v51 = vmul.f32 %v733_v4, %v276_v41  ;;  %v402_v52 = vmax.f32 %v338_v38, 0.0  ;;  %v342_v53 = vmul.f32 %v733_v4, %v277_v42  ;;  %v281_v54 = vsub.f32 %v215_v43, %v731_v3  ;;  %v227_v31 = vld [vmem:[%s724_s17 + $0xd8] sm:$0xff]  ;;  %v230_v43 = vld [vmem:[%s724_s17 + $0xf0] sm:$0xff] }
  0x1c   : > { %462 = vst [vmem:[%s757_s23 + $0x18] sm:$0xff] %v398_v36  ;;  %v403_v58 = vmax.f32 %v339_v49, 0.0  ;;  %v343_v59 = vmul.f32 %v733_v4, %v278_v45  ;;  %v404_v61 = vmax.f32 %v340_v50, 0.0  ;;  %v344_v62 = vmul.f32 %v733_v4, %v279_v46 }
  0x1d   : > { %463 = vst [vmem:[%s757_s23 + $0x20] sm:$0xff] %v399_v37  ;;  %v345_v63 = vmul.f32 %v733_v4, %v280_v47  ;;  %v405_v1 = vmax.f32 %v341_v51, 0.0  ;;  %v282_v2 = vsub.f32 %v216_v55, %v731_v3  ;;  %v283_v5 = vsub.f32 %v217_v56, %v731_v3  ;;  %v231_v47 = vld [vmem:[%s724_s17 + $0xf8] sm:$0xff]  ;;  %v232_v51 = vld [vmem:[%s724_s17 + $0x100] sm:$0xff]  ;;  %v233_v55 = vld [vmem:[%s724_s17 + $0x108] sm:$0xff] }
  0x1e   : > { %464 = vst [vmem:[%s757_s23 + $0x28] sm:$0xff] %v400_v44  ;;  %v284_v6 = vsub.f32 %v218_v57, %v731_v3  ;;  %v406_v8 = vmax.f32 %v342_v53, 0.0  ;;  %v346_v9 = vmul.f32 %v733_v4, %v281_v54  ;;  %v285_v10 = vsub.f32 %v219_v60, %v731_v3 }
  0x1f   : > { %465 = vst [vmem:[%s757_s23 + $0x30] sm:$0xff] %v401_v48  ;;  %v407_v12 = vmax.f32 %v343_v59, 0.0  ;;  %v347_v13 = vmul.f32 %v733_v4, %v282_v2  ;;  %v286_v14 = vsub.f32 %v220_v0, %v731_v3  ;;  %v408_v16 = vmax.f32 %v344_v62, 0.0  ;;  %v234_v59 = vld [vmem:[%s724_s17 + $0x110] sm:$0xff] }
  0x20   : > { %466 = vst [vmem:[%s757_s23 + $0x38] sm:$0xff] %v402_v52  ;;  %v348_v17 = vmul.f32 %v733_v4, %v283_v5  ;;  %v287_v18 = vsub.f32 %v221_v7, %v731_v3  ;;  %v409_v20 = vmax.f32 %v345_v63, 0.0  ;;  %v349_v21 = vmul.f32 %v733_v4, %v284_v6  ;;  %v235_v63 = vld [vmem:[%s724_s17 + $0x118] sm:$0xff]  ;;  %v236_v5 = vld [vmem:[%s724_s17 + $0x120] sm:$0xff] }
  0x21   : > { %467 = vst [vmem:[%s757_s23 + $0x40] sm:$0xff] %v403_v58  ;;  %v288_v22 = vsub.f32 %v222_v11, %v731_v3  ;;  %v410_v24 = vmax.f32 %v346_v9, 0.0  ;;  %v350_v25 = vmul.f32 %v733_v4, %v285_v10  ;;  %v289_v26 = vsub.f32 %v223_v15, %v731_v3  ;;  %v237_v9 = vld [vmem:[%s724_s17 + $0x128] sm:$0xff] }
  0x22   : > { %468 = vst [vmem:[%s757_s23 + $0x48] sm:$0xff] %v404_v61  ;;  %v411_v28 = vmax.f32 %v347_v13, 0.0  ;;  %v351_v29 = vmul.f32 %v733_v4, %v286_v14  ;;  %v290_v30 = vsub.f32 %v224_v19, %v731_v3  ;;  %v412_v32 = vmax.f32 %v348_v17, 0.0  ;;  %v238_v13 = vld [vmem:[%s724_s17 + $0x130] sm:$0xff]  ;;  %v239_v17 = vld [vmem:[%s724_s17 + $0x138] sm:$0xff] }
  0x23   : > { %469 = vst [vmem:[%s757_s23 + $0x50] sm:$0xff] %v405_v1  ;;  %v352_v33 = vmul.f32 %v733_v4, %v287_v18  ;;  %v291_v34 = vsub.f32 %v225_v23, %v731_v3  ;;  %v413_v36 = vmax.f32 %v349_v21, 0.0  ;;  %v353_v37 = vmul.f32 %v733_v4, %v288_v22  ;;  %v240_v21 = vld [vmem:[%s724_s17 + $0x140] sm:$0xff] }
  0x24   : > { %470 = vst [vmem:[%s757_s23 + $0x58] sm:$0xff] %v406_v8  ;;  %v292_v38 = vsub.f32 %v226_v27, %v731_v3  ;;  %v414_v40 = vmax.f32 %v350_v25, 0.0  ;;  %v354_v41 = vmul.f32 %v733_v4, %v289_v26  ;;  %v293_v42 = vsub.f32 %v227_v31, %v731_v3  ;;  %v241_v25 = vld [vmem:[%s724_s17 + $0x148] sm:$0xff] }
  0x25   : > { %471 = vst [vmem:[%s757_s23 + $0x60] sm:$0xff] %v407_v12  ;;  %v415_v44 = vmax.f32 %v351_v29, 0.0  ;;  %v355_v45 = vmul.f32 %v733_v4, %v290_v30  ;;  %v294_v46 = vsub.f32 %v228_v35, %v731_v3  ;;  %v416_v48 = vmax.f32 %v352_v33, 0.0  ;;  %v242_v29 = vld [vmem:[%s724_s17 + $0x150] sm:$0xff]  ;;  %v243_v33 = vld [vmem:[%s724_s17 + $0x158] sm:$0xff] }
  0x26   : > { %472 = vst [vmem:[%s757_s23 + $0x68] sm:$0xff] %v408_v16  ;;  %v356_v49 = vmul.f32 %v733_v4, %v291_v34  ;;  %v295_v50 = vsub.f32 %v229_v39, %v731_v3  ;;  %v417_v52 = vmax.f32 %v353_v37, 0.0  ;;  %v357_v53 = vmul.f32 %v733_v4, %v292_v38  ;;  %v244_v37 = vld [vmem:[%s724_s17 + $0x160] sm:$0xff] }
  0x27   : > { %473 = vst [vmem:[%s757_s23 + $0x70] sm:$0xff] %v409_v20  ;;  %v296_v54 = vsub.f32 %v230_v43, %v731_v3  ;;  %v418_v56 = vmax.f32 %v354_v41, 0.0  ;;  %v358_v57 = vmul.f32 %v733_v4, %v293_v42  ;;  %v297_v58 = vsub.f32 %v231_v47, %v731_v3  ;;  %v245_v41 = vld [vmem:[%s724_s17 + $0x168] sm:$0xff] }
  0x28   : > { %474 = vst [vmem:[%s757_s23 + $0x78] sm:$0xff] %v410_v24  ;;  %v419_v60 = vmax.f32 %v355_v45, 0.0  ;;  %v359_v61 = vmul.f32 %v733_v4, %v294_v46  ;;  %v298_v62 = vsub.f32 %v232_v51, %v731_v3  ;;  %v420_v0 = vmax.f32 %v356_v49, 0.0  ;;  %v246_v45 = vld [vmem:[%s724_s17 + $0x170] sm:$0xff]  ;;  %v247_v49 = vld [vmem:[%s724_s17 + $0x178] sm:$0xff] }
  0x29   : > { %475 = vst [vmem:[%s757_s23 + $0x80] sm:$0xff] %v411_v28  ;;  %v360_v1 = vmul.f32 %v733_v4, %v295_v50  ;;  %v299_v2 = vsub.f32 %v233_v55, %v731_v3  ;;  %v421_v6 = vmax.f32 %v357_v53, 0.0  ;;  %v361_v7 = vmul.f32 %v733_v4, %v296_v54  ;;  %v248_v53 = vld [vmem:[%s724_s17 + $0x180] sm:$0xff] }
  0x2a   : > { %476 = vst [vmem:[%s757_s23 + $0x88] sm:$0xff] %v412_v32  ;;  %v300_v8 = vsub.f32 %v234_v59, %v731_v3  ;;  %v422_v10 = vmax.f32 %v358_v57, 0.0  ;;  %v362_v11 = vmul.f32 %v733_v4, %v297_v58  ;;  %v301_v12 = vsub.f32 %v235_v63, %v731_v3  ;;  %v249_v57 = vld [vmem:[%s724_s17 + $0x188] sm:$0xff]  ;;  %v263_v58 = vld [vmem:[%s724_s17 + $0x1f8] sm:$0xff] }
  0x2b   : > { %477 = vst [vmem:[%s757_s23 + $0x90] sm:$0xff] %v413_v36  ;;  %v423_v14 = vmax.f32 %v359_v61, 0.0  ;;  %v363_v15 = vmul.f32 %v733_v4, %v298_v62  ;;  %v302_v16 = vsub.f32 %v236_v5, %v731_v3  ;;  %v424_v18 = vmax.f32 %v360_v1, 0.0  ;;  %v250_v62 = vld [vmem:[%s724_s17 + $0x190] sm:$0xff] }
  0x2c   : > { %478 = vst [vmem:[%s757_s23 + $0x98] sm:$0xff] %v414_v40  ;;  %v364_v19 = vmul.f32 %v733_v4, %v299_v2  ;;  %v303_v20 = vsub.f32 %v237_v9, %v731_v3  ;;  %v425_v22 = vmax.f32 %v361_v7, 0.0  ;;  %v365_v23 = vmul.f32 %v733_v4, %v300_v8  ;;  %v251_v2 = vld [vmem:[%s724_s17 + $0x198] sm:$0xff]  ;;  %v252_v8 = vld [vmem:[%s724_s17 + $0x1a0] sm:$0xff] }
  0x2d   : > { %479 = vst [vmem:[%s757_s23 + $0xa0] sm:$0xff] %v415_v44  ;;  %v304_v24 = vsub.f32 %v238_v13, %v731_v3  ;;  %v426_v26 = vmax.f32 %v362_v11, 0.0  ;;  %v366_v27 = vmul.f32 %v733_v4, %v301_v12  ;;  %v305_v28 = vsub.f32 %v239_v17, %v731_v3  ;;  %v253_v13 = vld [vmem:[%s724_s17 + $0x1a8] sm:$0xff]  ;;  %v254_v17 = vld [vmem:[%s724_s17 + $0x1b0] sm:$0xff] }
  0x2e   : > { %480 = vst [vmem:[%s757_s23 + $0xa8] sm:$0xff] %v416_v48  ;;  %v427_v30 = vmax.f32 %v363_v15, 0.0  ;;  %v367_v31 = vmul.f32 %v733_v4, %v302_v16  ;;  %v306_v32 = vsub.f32 %v240_v21, %v731_v3  ;;  %v428_v34 = vmax.f32 %v364_v19, 0.0 }
  0x2f   : > { %481 = vst [vmem:[%s757_s23 + $0xb0] sm:$0xff] %v417_v52  ;;  %v368_v35 = vmul.f32 %v733_v4, %v303_v20  ;;  %v307_v36 = vsub.f32 %v241_v25, %v731_v3  ;;  %v429_v38 = vmax.f32 %v365_v23, 0.0  ;;  %v369_v39 = vmul.f32 %v733_v4, %v304_v24 }
  0x30   : > { %482 = vst [vmem:[%s757_s23 + $0xb8] sm:$0xff] %v418_v56  ;;  %v308_v40 = vsub.f32 %v242_v29, %v731_v3  ;;  %v430_v42 = vmax.f32 %v366_v27, 0.0  ;;  %v370_v43 = vmul.f32 %v733_v4, %v305_v28  ;;  %v309_v44 = vsub.f32 %v243_v33, %v731_v3 }
  0x31   : > { %483 = vst [vmem:[%s757_s23 + $0xc0] sm:$0xff] %v419_v60  ;;  %v431_v46 = vmax.f32 %v367_v31, 0.0  ;;  %v371_v47 = vmul.f32 %v733_v4, %v306_v32  ;;  %v310_v48 = vsub.f32 %v244_v37, %v731_v3  ;;  %v432_v50 = vmax.f32 %v368_v35, 0.0 }
  0x32   : > { %484 = vst [vmem:[%s757_s23 + $0xc8] sm:$0xff] %v420_v0  ;;  %v372_v51 = vmul.f32 %v733_v4, %v307_v36  ;;  %v311_v52 = vsub.f32 %v245_v41, %v731_v3  ;;  %v433_v54 = vmax.f32 %v369_v39, 0.0  ;;  %v373_v55 = vmul.f32 %v733_v4, %v308_v40 }
  0x33   : > { %485 = vst [vmem:[%s757_s23 + $0xd0] sm:$0xff] %v421_v6  ;;  %v312_v56 = vsub.f32 %v246_v45, %v731_v3  ;;  %v434_v59 = vmax.f32 %v370_v43, 0.0  ;;  %v374_v60 = vmul.f32 %v733_v4, %v309_v44  ;;  %v313_v61 = vsub.f32 %v247_v49, %v731_v3 }
  0x34   : > { %486 = vst [vmem:[%s757_s23 + $0xd8] sm:$0xff] %v422_v10  ;;  %v435_v63 = vmax.f32 %v371_v47, 0.0  ;;  %v375_v0 = vmul.f32 %v733_v4, %v310_v48  ;;  %v314_v1 = vsub.f32 %v248_v53, %v731_v3  ;;  %v436_v5 = vmax.f32 %v372_v51, 0.0 }
  0x35   : > { %487 = vst [vmem:[%s757_s23 + $0xe0] sm:$0xff] %v423_v14  ;;  %v376_v6 = vmul.f32 %v733_v4, %v311_v52  ;;  %v315_v7 = vsub.f32 %v249_v57, %v731_v3  ;;  %v329_v9 = vsub.f32 %v263_v58, %v731_v3  ;;  %v437_v10 = vmax.f32 %v373_v55, 0.0 }
  0x36   : > { %488 = vst [vmem:[%s757_s23 + $0xe8] sm:$0xff] %v424_v18  ;;  %v377_v11 = vmul.f32 %v733_v4, %v312_v56  ;;  %v316_v12 = vsub.f32 %v250_v62, %v731_v3  ;;  %v438_v14 = vmax.f32 %v374_v60, 0.0  ;;  %v378_v15 = vmul.f32 %v733_v4, %v313_v61 }
  0x37   : > { %489 = vst [vmem:[%s757_s23 + $0xf0] sm:$0xff] %v425_v22  ;;  %v317_v16 = vsub.f32 %v251_v2, %v731_v3  ;;  %v936_v18 = vmul.f32 %v733_v4, %v329_v9  ;;  %v439_v19 = vmax.f32 %v375_v0, 0.0  ;;  %v379_v20 = vmul.f32 %v733_v4, %v314_v1  ;;  %v255_v22 = vld [vmem:[%s724_s17 + $0x1b8] sm:$0xff] }
  0x38   : > { %490 = vst [vmem:[%s757_s23 + $0xf8] sm:$0xff] %v426_v26  ;;  %v318_v21 = vsub.f32 %v252_v8, %v731_v3  ;;  %v440_v23 = vmax.f32 %v376_v6, 0.0  ;;  %v380_v24 = vmul.f32 %v733_v4, %v315_v7  ;;  %v319_v25 = vsub.f32 %v253_v13, %v731_v3  ;;  %v256_v26 = vld [vmem:[%s724_s17 + $0x1c0] sm:$0xff] }
  0x39   : > { %491 = vst [vmem:[%s757_s23 + $0x100] sm:$0xff] %v427_v30  ;;  %v441_v27 = vmax.f32 %v377_v11, 0.0  ;;  %v381_v28 = vmul.f32 %v733_v4, %v316_v12  ;;  %v320_v29 = vsub.f32 %v254_v17, %v731_v3  ;;  %v257_v30 = vld [vmem:[%s724_s17 + $0x1c8] sm:$0xff]  ;;  %v442_v31 = vmax.f32 %v378_v15, 0.0 }
  0x3a   : > { %492 = vst [vmem:[%s757_s23 + $0x108] sm:$0xff] %v428_v34  ;;  %v382_v32 = vmul.f32 %v733_v4, %v317_v16  ;;  %v321_v33 = vsub.f32 %v255_v22, %v731_v3  ;;  %v258_v34 = vld [vmem:[%s724_s17 + $0x1d0] sm:$0xff]  ;;  %v443_v35 = vmax.f32 %v379_v20, 0.0  ;;  %v383_v36 = vmul.f32 %v733_v4, %v318_v21 }
  0x3b   : > { %493 = vst [vmem:[%s757_s23 + $0x110] sm:$0xff] %v429_v38  ;;  %v322_v37 = vsub.f32 %v256_v26, %v731_v3  ;;  %v259_v38 = vld [vmem:[%s724_s17 + $0x1d8] sm:$0xff]  ;;  %v444_v39 = vmax.f32 %v380_v24, 0.0  ;;  %v384_v40 = vmul.f32 %v733_v4, %v319_v25  ;;  %v323_v41 = vsub.f32 %v257_v30, %v731_v3 }
  0x3c   : > { %494 = vst [vmem:[%s757_s23 + $0x118] sm:$0xff] %v430_v42  ;;  %v260_v42 = vld [vmem:[%s724_s17 + $0x1e0] sm:$0xff]  ;;  %v445_v43 = vmax.f32 %v381_v28, 0.0  ;;  %v385_v44 = vmul.f32 %v733_v4, %v320_v29  ;;  %v324_v45 = vsub.f32 %v258_v34, %v731_v3  ;;  %v446_v47 = vmax.f32 %v382_v32, 0.0 }
  0x3d   : > { %495 = vst [vmem:[%s757_s23 + $0x120] sm:$0xff] %v431_v46  ;;  %v261_v46 = vld [vmem:[%s724_s17 + $0x1e8] sm:$0xff]  ;;  %v386_v48 = vmul.f32 %v733_v4, %v321_v33  ;;  %v325_v49 = vsub.f32 %v259_v38, %v731_v3  ;;  %v447_v51 = vmax.f32 %v383_v36, 0.0  ;;  %v387_v52 = vmul.f32 %v733_v4, %v322_v37 }
  0x3e   : > { %496 = vst [vmem:[%s757_s23 + $0x128] sm:$0xff] %v432_v50  ;;  %v262_v50 = vld [vmem:[%s724_s17 + $0x1f0] sm:$0xff]  ;;  %v326_v53 = vsub.f32 %v260_v42, %v731_v3  ;;  %v388_v55 = vmul.f32 %v733_v4, %v323_v41  ;;  %v327_v56 = vsub.f32 %v261_v46, %v731_v3  ;;  %v449_v57 = vmax.f32 %v385_v44, 0.0 }
  0x3f   : > { %497 = vst [vmem:[%s757_s23 + $0x130] sm:$0xff] %v433_v54  ;;  %v448_v54 = vmax.f32 %v384_v40, 0.0  ;;  %v389_v58 = vmul.f32 %v733_v4, %v324_v45  ;;  %v450_v60 = vmax.f32 %v386_v48, 0.0  ;;  %v390_v61 = vmul.f32 %v733_v4, %v325_v49 }
  0x40   : > { %498 = vst [vmem:[%s757_s23 + $0x138] sm:$0xff] %v434_v59  ;;  %v328_v59 = vsub.f32 %v262_v50, %v731_v3  ;;  %v451_v62 = vmax.f32 %v387_v52, 0.0  ;;  %v452_v0 = vmax.f32 %v388_v55, 0.0  ;;  %v392_v1 = vmul.f32 %v733_v4, %v327_v56 }
  0x41   : > { %499 = vst [vmem:[%s757_s23 + $0x140] sm:$0xff] %v435_v63  ;;  %v391_v63 = vmul.f32 %v733_v4, %v326_v53  ;;  %v453_v3 = vmax.f32 %v389_v58, 0.0  ;;  %v458_v9 = vmax.f32 %v936_v18, 0.0 }
  0x42   : > { %500 = vst [vmem:[%s757_s23 + $0x148] sm:$0xff] %v436_v5  ;;  %v393_v2 = vmul.f32 %v733_v4, %v328_v59  ;;  %v454_v5 = vmax.f32 %v390_v61, 0.0  ;;  %v456_v7 = vmax.f32 %v392_v1, 0.0 }
  0x43   : > { %501 = vst [vmem:[%s757_s23 + $0x150] sm:$0xff] %v437_v10  ;;  %v455_v6 = vmax.f32 %v391_v63, 0.0 }
  0x44   : > { %502 = vst [vmem:[%s757_s23 + $0x158] sm:$0xff] %v438_v14  ;;  %v457_v8 = vmax.f32 %v393_v2, 0.0 }
  0x45   : > { %503 = vst [vmem:[%s757_s23 + $0x160] sm:$0xff] %v439_v19 }
  0x46   : > { %504 = vst [vmem:[%s757_s23 + $0x168] sm:$0xff] %v440_v23 }
  0x47   : > { %505 = vst [vmem:[%s757_s23 + $0x170] sm:$0xff] %v441_v27 }
  0x48   : > { %506 = vst [vmem:[%s757_s23 + $0x178] sm:$0xff] %v442_v31 }
  0x49   : > { %507 = vst [vmem:[%s757_s23 + $0x180] sm:$0xff] %v443_v35 }
  0x4a   : > { %508 = vst [vmem:[%s757_s23 + $0x188] sm:$0xff] %v444_v39 }
  0x4b   : > { %509 = vst [vmem:[%s757_s23 + $0x190] sm:$0xff] %v445_v43 }
  0x4c   : > { %510 = vst [vmem:[%s757_s23 + $0x198] sm:$0xff] %v446_v47 }
  0x4d   : > { %511 = vst [vmem:[%s757_s23 + $0x1a0] sm:$0xff] %v447_v51 }
  0x4e   : > { %512 = vst [vmem:[%s757_s23 + $0x1a8] sm:$0xff] %v448_v54 }
  0x4f   : > { %513 = vst [vmem:[%s757_s23 + $0x1b0] sm:$0xff] %v449_v57 }
  0x50   : > { %514 = vst [vmem:[%s757_s23 + $0x1b8] sm:$0xff] %v450_v60 }
  0x51   : > { %515 = vst [vmem:[%s757_s23 + $0x1c0] sm:$0xff] %v451_v62 }
  0x52   : > { %516 = vst [vmem:[%s757_s23 + $0x1c8] sm:$0xff] %v452_v0 }
  0x53   : > { %517 = vst [vmem:[%s757_s23 + $0x1d0] sm:$0xff] %v453_v3 }
  0x54   : > { %518 = vst [vmem:[%s757_s23 + $0x1d8] sm:$0xff] %v454_v5 }
  0x55   : > { %519 = vst [vmem:[%s757_s23 + $0x1e0] sm:$0xff] %v455_v6 }
  0x56   : > { %520 = vst [vmem:[%s757_s23 + $0x1e8] sm:$0xff] %v456_v7 }
  0x57   : > { %521 = vst [vmem:[%s757_s23 + $0x1f0] sm:$0xff] %v457_v8 }
  0x58   : > { %522 = vst [vmem:[%s757_s23 + $0x1f8] sm:$0xff] %v458_v9 }
  0x59 PF: > { %s12_s11 = sadd.s32 1, %s682_s11   ;;  %s1009_s9 = smov %s678_s10 }
  0x5a   : > { %p9_p5 = scmp.ge.s32.totalorder %s12_s11, 4   ;;  %s1010_s10 = smov %s1012_s12 }
  0x5c   :  { %11 = sbr.rel (!%p9_p5) target bundleno = 2 (0x2), region = 61 }

</bundles_post_ra>
